<compile_context>
chip_gen: v5e
topology: v5e:2x2
jax: 0.10.0
libtpu: 0.0.40
codegen_flags: <defaults>
</compile_context>

<pallas_src>
import functools

import jax
import jax.numpy as jnp
import numpy as np
from jax.experimental import pallas as pl
from jax.experimental.pallas import tpu as pltpu


# ----------------------------------------------------------------------------
# kernel
# ----------------------------------------------------------------------------
def _layernorm_f32(v, w, b, eps=1e-5):
    # v is already float32; w, b are (1, D) float32 (fp16-safe LayerNorm).
    mu = jnp.mean(v, axis=-1, keepdims=True)
    c = v - mu
    var = jnp.mean(c * c, axis=-1, keepdims=True)
    return c * jax.lax.rsqrt(var + eps) * w + b


def _rab_kernel(x_ref,
                ln1w_ref, ln1b_ref,
                wqkv_ref, bqkv_ref,
                wo_ref, bo_ref,
                ln2w_ref, ln2b_ref,
                wfc_ref, bfc_ref,
                wproj_ref, bproj_ref,
                o_ref, *, n_head, compute_dtype):
    B, L, D = x_ref.shape          # block shape: (block_batch, L, D)
    H = n_head
    hd = D // H
    R = B * L
    cdt = compute_dtype

    x = x_ref[...].astype(jnp.float32)                    # f32 residual stream

    # ---- x = x + attn(ln_1(x)) ----------------------------------------------
    x1 = _layernorm_f32(x, ln1w_ref[...], ln1b_ref[...])
    rows = x1.reshape(R, D).astype(cdt)

    # Fused QKV projection: one MXU-wide matmul; query scale already folded in.
    qkv = jnp.dot(rows, wqkv_ref[...], preferred_element_type=jnp.float32)
    qkv = (qkv + bqkv_ref[...]).reshape(B, L, 3 * D)       # f32, (B, L, 3D)

    attn_acc = jnp.zeros((R, D), jnp.float32)
    for h in range(H):                                     # static unroll over heads
        qh = qkv[:, :, h * hd:(h + 1) * hd].astype(cdt)                # (B, L, hd)
        kh = qkv[:, :, D + h * hd:D + (h + 1) * hd].astype(cdt)
        vh = qkv[:, :, 2 * D + h * hd:2 * D + (h + 1) * hd].astype(cdt)

        s = jnp.einsum('bqd,bkd->bqk', qh, kh,
                       preferred_element_type=jnp.float32)             # (B, L, L)
        s = s - jnp.max(s, axis=-1, keepdims=True)
        p = jnp.exp(s)                                                 # unnormalized
        denom = jnp.sum(p, axis=-1, keepdims=True)                     # (B, L, 1)
        ctx = jnp.einsum('bqk,bkd->bqd', p.astype(cdt), vh,
                         preferred_element_type=jnp.float32)           # (B, L, hd)
        # Deferred normalization (cheaper: hd lanes instead of L) via EUP recip.
        ctx = ctx * pl.reciprocal(denom, approx=True)
        # Accumulate this head's contribution to the output projection directly.
        attn_acc = attn_acc + jnp.dot(ctx.reshape(R, hd).astype(cdt), wo_ref[h],
                                      preferred_element_type=jnp.float32)

    attn_out = attn_acc + bo_ref[...]
    x2 = x + attn_out.reshape(B, L, D)                     # f32 residual add

    # ---- x = x + mlp(ln_2(x)) -------------------------------------------------
    x2n = _layernorm_f32(x2, ln2w_ref[...], ln2b_ref[...])
    h1 = jnp.dot(x2n.reshape(R, D).astype(cdt), wfc_ref[...],
                 preferred_element_type=jnp.float32)
    h1 = h1 + bfc_ref[...]                                 # (R, 4D) f32
    g = h1 * jax.nn.sigmoid(1.702 * h1)                    # QuickGELU in f32
    h2 = jnp.dot(g.astype(cdt), wproj_ref[...],
                 preferred_element_type=jnp.float32)
    h2 = h2 + bproj_ref[...]
    out = x2 + h2.reshape(B, L, D)

    o_ref[...] = out.astype(o_ref.dtype)


# ----------------------------------------------------------------------------
# wrapper
# ----------------------------------------------------------------------------
def _prepare_params(params, n_head, compute_dtype):
    """Fold the query scale, pre-shape W_o per head, cast weights to bf16."""
    (ln1_w, ln1_b, w_qkv, b_qkv, w_o, b_o,
     ln2_w, ln2_b, w_fc, b_fc, w_proj, b_proj) = params
    D = w_o.shape[0]
    hd = D // n_head
    scale = 1.0 / float(np.sqrt(hd))

    # fold 1/sqrt(hd) into the Q columns (weights are stored (D, 3D), x @ W).
    w_qkv = jnp.concatenate([w_qkv[:, :D] * scale, w_qkv[:, D:]], axis=1)
    b_qkv = jnp.concatenate([b_qkv[:, :D] * scale, b_qkv[:, D:]], axis=1)
    w_o_h = w_o.reshape(n_head, hd, D)     # rows of W_o grouped per head

    cd = compute_dtype
    f32 = jnp.float32
    return (ln1_w.astype(f32), ln1_b.astype(f32),
            w_qkv.astype(cd), b_qkv.astype(f32),
            w_o_h.astype(cd), b_o.astype(f32),
            ln2_w.astype(f32), ln2_b.astype(f32),
            w_fc.astype(cd), b_fc.astype(f32),
            w_proj.astype(cd), b_proj.astype(f32))


def _pick_block_batch(n_batch, seq_len, target_rows=512):
    """Largest batch tile (divisor of N) with <= target rows, keeping >=2 grid
    steps when possible so both v7x TensorCores are used."""
    best = 1
    for cand in range(1, n_batch + 1):
        if n_batch % cand:
            continue
        if cand * seq_len > target_rows:
            break
        if n_batch // cand >= 2 or n_batch == 1:
            best = cand
    return best


def _estimate_vmem_bytes(block_batch, L, D, n_head, x_itemsize, c_itemsize):
    rows = block_batch * L
    weights = (3 * D * D + D * D + 4 * D * D + 4 * D * D) * c_itemsize
    vectors = (3 * D + D + 4 * D + D + 4 * D) * 4                    # biases + LN (f32)
    io = 2 * 2 * block_batch * L * D * x_itemsize                    # x & out, double buffered
    acts = rows * (D + 3 * D + D + 4 * D + 4 * D + D) * 4            # f32 intermediates
    scores = 2 * block_batch * L * L * 4                             # one head's scores live
    return 2 * weights + vectors + io + 2 * acts + scores


def _pallas_forward(xb, prepped, n_head, block_batch, compute_dtype,
                    single_buffer_weights):
    N, L, D = xb.shape
    grid = (N // block_batch,)

    def weight_spec(arr):
        nd = arr.ndim
        kwargs = {}
        if single_buffer_weights:
            # Grid-invariant blocks: no double-buffering needed (halves weight VMEM).
            kwargs["pipeline_mode"] = pl.Buffered(1)
        return pl.BlockSpec(arr.shape, lambda b, _nd=nd: (0,) * _nd, **kwargs)

    est = _estimate_vmem_bytes(block_batch, L, D, n_head,
                               jnp.dtype(xb.dtype).itemsize,
                               jnp.dtype(compute_dtype).itemsize)
    vmem_limit = int(min(96 * 2 ** 20, max(32 * 2 ** 20, 1.5 * est)))

    kernel = functools.partial(_rab_kernel, n_head=n_head,
                               compute_dtype=compute_dtype)

    return pl.pallas_call(
        kernel,
        out_shape=jax.ShapeDtypeStruct((N, L, D), xb.dtype),
        grid=grid,
        in_specs=[pl.BlockSpec((block_batch, L, D), lambda b: (b, 0, 0))]
                 + [weight_spec(p) for p in prepped],
        out_specs=pl.BlockSpec((block_batch, L, D), lambda b: (b, 0, 0)),
        compiler_params=pltpu.CompilerParams(
            dimension_semantics=("parallel",),
            vmem_limit_bytes=vmem_limit),
    )(xb, *prepped)


def residual_attention_block(x, params, n_head, *,
                             compute_dtype=jnp.bfloat16, block_batch=None):
    """x: (L, N, D), PyTorch nn.MultiheadAttention seq-first convention."""
    L, N, D = x.shape
    xb = jnp.transpose(x, (1, 0, 2))                       # (N, L, D)
    prepped = _prepare_params(params, n_head, compute_dtype)

    if block_batch is None:
        block_batch = _pick_block_batch(N, L)
    if N % block_batch != 0:
        raise ValueError("block_batch must divide the batch size")

    try:
        out = _pallas_forward(xb, prepped, n_head, block_batch, compute_dtype,
                              single_buffer_weights=True)
    except Exception:
        # pl.Buffered(1) single-buffering unavailable in this build: fall back.
        out = _pallas_forward(xb, prepped, n_head, block_batch, compute_dtype,
                              single_buffer_weights=False)

    return jnp.transpose(out, (1, 0, 2))                   # back to (L, N, D)


# ----------------------------------------------------------------------------
# pure-JAX reference (mirrors the PyTorch forward exactly, all f32)
# ----------------------------------------------------------------------------
def reference_block(x, params, n_head):
    (ln1_w, ln1_b, w_qkv, b_qkv, w_o, b_o,
     ln2_w, ln2_b, w_fc, b_fc, w_proj, b_proj) = params
    L, N, D = x.shape
    hd = D // n_head

    def ln(v, w, b):
        mu = v.mean(-1, keepdims=True)
        var = ((v - mu) ** 2).mean(-1, keepdims=True)
        return (v - mu) / jnp.sqrt(var + 1e-5) * w[0] + b[0]

    x1 = ln(x, ln1_w, ln1_b)                               # (L, N, D)
    qkv = jnp.einsum('lnd,de->lne', x1, w_qkv) + b_qkv[0]
    q, k, v = qkv[..., :D], qkv[..., D:2 * D], qkv[..., 2 * D:]
    qh = q.reshape(L, N, n_head, hd).transpose(1, 2, 0, 3) / np.sqrt(hd)
    kh = k.reshape(L, N, n_head, hd).transpose(1, 2, 0, 3)
    vh = v.reshape(L, N, n_head, hd).transpose(1, 2, 0, 3)
    s = jnp.einsum('nhqd,nhkd->nhqk', qh, kh)
    p = jax.nn.softmax(s, axis=-1)
    o = jnp.einsum('nhqk,nhkd->nhqd', p, vh)
    o = o.transpose(2, 0, 1, 3).reshape(L, N, D)
    attn_out = jnp.einsum('lnd,de->lne', o, w_o) + b_o[0]
    x2 = x + attn_out
    x2n = ln(x2, ln2_w, ln2_b)
    h1 = jnp.einsum('lnd,de->lne', x2n, w_fc) + b_fc[0]
    g = h1 * jax.nn.sigmoid(1.702 * h1)
    h2 = jnp.einsum('lne,ed->lnd', g, w_proj) + b_proj[0]
    return x2 + h2


def make_params(key, d_model):
    """Deterministic synthetic parameters (shapes from the module __init__).
    Weights are stored pre-transposed so the kernel does x @ W."""
    ks = jax.random.split(key, 8)
    s = 0.05
    ln1_w = jnp.ones((1, d_model), jnp.float32)
    ln1_b = jnp.zeros((1, d_model), jnp.float32)
    ln2_w = jnp.ones((1, d_model), jnp.float32)
    ln2_b = jnp.zeros((1, d_model), jnp.float32)
    w_qkv = s * jax.random.normal(ks[0], (d_model, 3 * d_model), jnp.float32)
    b_qkv = s * jax.random.normal(ks[1], (1, 3 * d_model), jnp.float32)
    w_o = s * jax.random.normal(ks[2], (d_model, d_model), jnp.float32)
    b_o = s * jax.random.normal(ks[3], (1, d_model), jnp.float32)
    w_fc = s * jax.random.normal(ks[4], (d_model, 4 * d_model), jnp.float32)
    b_fc = s * jax.random.normal(ks[5], (1, 4 * d_model), jnp.float32)
    w_proj = s * jax.random.normal(ks[6], (4 * d_model, d_model), jnp.float32)
    b_proj = s * jax.random.normal(ks[7], (1, d_model), jnp.float32)
    return (ln1_w, ln1_b, w_qkv, b_qkv, w_o, b_o,
            ln2_w, ln2_b, w_fc, b_fc, w_proj, b_proj)


if __name__ == "__main__":
    # Small shapes consistent with the module: seq=8, batch=2, d_model=32, heads=4.
    L, N, D, H = 8, 2, 32, 4
    key = jax.random.PRNGKey(0)
    kx, kp = jax.random.split(key)
    x = jax.random.normal(kx, (L, N, D), jnp.float32)      # PyTorch-style (L, N, D)
    params = make_params(kp, D)

    ref = reference_block(x, params, H)

    # f32 compute path: should track the exact reference closely (only the
    # approx reciprocal / deferred normalization differ).
    out_f32 = jax.block_until_ready(
        residual_attention_block(x, params, H, compute_dtype=jnp.float32))
    assert out_f32.shape == (L, N, D)
    assert np.allclose(np.asarray(out_f32), np.asarray(ref), atol=2e-3, rtol=2e-3)

    # Default bf16 matmul operands (MXU-native) with f32 accumulation: looser
    # tolerance accounts for bf16 rounding of matmul inputs only.
    out_bf16 = jax.block_until_ready(residual_attention_block(x, params, H))
    assert out_bf16.shape == (L, N, D)
    assert np.all(np.isfinite(np.asarray(out_bf16)))
    assert np.allclose(np.asarray(out_bf16), np.asarray(ref), atol=2e-2, rtol=2e-2)

    print("KERNEL_OK")
</pallas_src>

<mosaic_0001>
module attributes {stable_mosaic.version = 11 : i64} {
  func.func @_rab_kernel(%arg0: i32, %arg1: memref<1x8x32xf32, #tpu.memory_space<vmem>>, %arg2: memref<1x32xf32, #tpu.memory_space<vmem>>, %arg3: memref<1x32xf32, #tpu.memory_space<vmem>>, %arg4: memref<32x96xf32, #tpu.memory_space<vmem>>, %arg5: memref<1x96xf32, #tpu.memory_space<vmem>>, %arg6: memref<4x8x32xf32, #tpu.memory_space<vmem>>, %arg7: memref<1x32xf32, #tpu.memory_space<vmem>>, %arg8: memref<1x32xf32, #tpu.memory_space<vmem>>, %arg9: memref<1x32xf32, #tpu.memory_space<vmem>>, %arg10: memref<32x128xf32, #tpu.memory_space<vmem>>, %arg11: memref<1x128xf32, #tpu.memory_space<vmem>>, %arg12: memref<128x32xf32, #tpu.memory_space<vmem>>, %arg13: memref<1x32xf32, #tpu.memory_space<vmem>>, %arg14: memref<1x8x32xf32, #tpu.memory_space<vmem>>) attributes {dimension_semantics = [#tpu.dimension_semantics<parallel>], iteration_bounds = array<i64: 2>, scalar_prefetch = 0 : i64, scratch_operands = 0 : i64, tpu.core_type = #tpu.core_type<tc>, window_params = [{transform_indices = @transform_0, window_bounds = array<i64: 1, 8, 32>}, {pipeline_mode = #tpu.pipeline_mode<synchronous>, transform_indices = @transform_1, window_bounds = array<i64: 1, 32>}, {pipeline_mode = #tpu.pipeline_mode<synchronous>, transform_indices = @transform_2, window_bounds = array<i64: 1, 32>}, {pipeline_mode = #tpu.pipeline_mode<synchronous>, transform_indices = @transform_3, window_bounds = array<i64: 32, 96>}, {pipeline_mode = #tpu.pipeline_mode<synchronous>, transform_indices = @transform_4, window_bounds = array<i64: 1, 96>}, {pipeline_mode = #tpu.pipeline_mode<synchronous>, transform_indices = @transform_5, window_bounds = array<i64: 4, 8, 32>}, {pipeline_mode = #tpu.pipeline_mode<synchronous>, transform_indices = @transform_6, window_bounds = array<i64: 1, 32>}, {pipeline_mode = #tpu.pipeline_mode<synchronous>, transform_indices = @transform_7, window_bounds = array<i64: 1, 32>}, {pipeline_mode = #tpu.pipeline_mode<synchronous>, transform_indices = @transform_8, window_bounds = array<i64: 1, 32>}, {pipeline_mode = #tpu.pipeline_mode<synchronous>, transform_indices = @transform_9, window_bounds = array<i64: 32, 128>}, {pipeline_mode = #tpu.pipeline_mode<synchronous>, transform_indices = @transform_10, window_bounds = array<i64: 1, 128>}, {pipeline_mode = #tpu.pipeline_mode<synchronous>, transform_indices = @transform_11, window_bounds = array<i64: 128, 32>}, {pipeline_mode = #tpu.pipeline_mode<synchronous>, transform_indices = @transform_12, window_bounds = array<i64: 1, 32>}, {transform_indices = @transform_13, window_bounds = array<i64: 1, 8, 32>}]} {
    %c0 = arith.constant 0 : index
    %c0_0 = arith.constant 0 : index
    %c0_1 = arith.constant 0 : index
    %0 = vector.load %arg1[%c0, %c0_0, %c0_1] : memref<1x8x32xf32, #tpu.memory_space<vmem>>, vector<1x8x32xf32>
    %c0_2 = arith.constant 0 : index
    %c0_3 = arith.constant 0 : index
    %1 = vector.load %arg2[%c0_2, %c0_3] : memref<1x32xf32, #tpu.memory_space<vmem>>, vector<1x32xf32>
    %c0_4 = arith.constant 0 : index
    %c0_5 = arith.constant 0 : index
    %2 = vector.load %arg3[%c0_4, %c0_5] : memref<1x32xf32, #tpu.memory_space<vmem>>, vector<1x32xf32>
    %cst = arith.constant dense<0.000000e+00> : vector<1x8xf32>
    %3 = vector.multi_reduction <add>, %0, %cst [2] : vector<1x8x32xf32> to vector<1x8xf32>
    %4 = vector.shape_cast %3 : vector<1x8xf32> to vector<1x8x1xf32>
    %cst_6 = arith.constant 3.200000e+01 : f32
    %5 = vector.broadcast %cst_6 : f32 to vector<1x8x1xf32>
    %6 = arith.divf %4, %5 : vector<1x8x1xf32>
    %7 = vector.broadcast %6 : vector<1x8x1xf32> to vector<1x8x32xf32>
    %8 = arith.subf %0, %7 : vector<1x8x32xf32>
    %9 = arith.mulf %8, %8 : vector<1x8x32xf32>
    %cst_7 = arith.constant dense<0.000000e+00> : vector<1x8xf32>
    %10 = vector.multi_reduction <add>, %9, %cst_7 [2] : vector<1x8x32xf32> to vector<1x8xf32>
    %11 = vector.shape_cast %10 : vector<1x8xf32> to vector<1x8x1xf32>
    %cst_8 = arith.constant 3.200000e+01 : f32
    %12 = vector.broadcast %cst_8 : f32 to vector<1x8x1xf32>
    %13 = arith.divf %11, %12 : vector<1x8x1xf32>
    %cst_9 = arith.constant 9.99999974E-6 : f32
    %14 = vector.broadcast %cst_9 : f32 to vector<1x8x1xf32>
    %15 = arith.addf %13, %14 : vector<1x8x1xf32>
    %16 = math.rsqrt %15 : vector<1x8x1xf32>
    %17 = vector.broadcast %16 : vector<1x8x1xf32> to vector<1x8x32xf32>
    %18 = arith.mulf %8, %17 : vector<1x8x32xf32>
    %19 = vector.shape_cast %1 : vector<1x32xf32> to vector<1x1x32xf32>
    %20 = vector.broadcast %19 : vector<1x1x32xf32> to vector<1x8x32xf32>
    %21 = arith.mulf %18, %20 : vector<1x8x32xf32>
    %22 = vector.shape_cast %2 : vector<1x32xf32> to vector<1x1x32xf32>
    %23 = vector.broadcast %22 : vector<1x1x32xf32> to vector<1x8x32xf32>
    %24 = arith.addf %21, %23 : vector<1x8x32xf32>
    %25 = vector.shape_cast %24 : vector<1x8x32xf32> to vector<8x32xf32>
    %c0_10 = arith.constant 0 : index
    %c0_11 = arith.constant 0 : index
    %26 = vector.load %arg4[%c0_10, %c0_11] : memref<32x96xf32, #tpu.memory_space<vmem>>, vector<32x96xf32>
    %cst_12 = arith.constant dense<0.000000e+00> : vector<8x96xf32>
    %27 = tpu.matmul %25, %26, %cst_12 {dimension_numbers = #tpu.dot_dimension_numbers<[1], [0], [0], [1], [0, 0, 1, 1], [], []>} : vector<8x32xf32>, vector<32x96xf32>, vector<8x96xf32> -> vector<8x96xf32>
    %c0_13 = arith.constant 0 : index
    %c0_14 = arith.constant 0 : index
    %28 = vector.load %arg5[%c0_13, %c0_14] : memref<1x96xf32, #tpu.memory_space<vmem>>, vector<1x96xf32>
    %29 = vector.broadcast %28 : vector<1x96xf32> to vector<8x96xf32>
    %30 = arith.addf %27, %29 : vector<8x96xf32>
    %31 = vector.shape_cast %30 : vector<8x96xf32> to vector<1x8x96xf32>
    %cst_15 = arith.constant 0.000000e+00 : f32
    %32 = vector.broadcast %cst_15 : f32 to vector<8x32xf32>
    %33 = vector.extract_strided_slice %31 {offsets = [0, 0, 0], sizes = [1, 8, 8], strides = [1, 1, 1]} : vector<1x8x96xf32> to vector<1x8x8xf32>
    %34 = vector.extract_strided_slice %31 {offsets = [0, 0, 32], sizes = [1, 8, 8], strides = [1, 1, 1]} : vector<1x8x96xf32> to vector<1x8x8xf32>
    %35 = vector.extract_strided_slice %31 {offsets = [0, 0, 64], sizes = [1, 8, 8], strides = [1, 1, 1]} : vector<1x8x96xf32> to vector<1x8x8xf32>
    "tpu.trace_start"() <{level = 10 : i32, message = "bqd,bkd->bqk"}> : () -> ()
    %cst_16 = arith.constant dense<0.000000e+00> : vector<1x8x8xf32>
    %36 = tpu.matmul %33, %34, %cst_16 {dimension_numbers = #tpu.dot_dimension_numbers<[2], [2], [1], [1], [0, 0, 0, 1, 1, 1], [0], [0]>} : vector<1x8x8xf32>, vector<1x8x8xf32>, vector<1x8x8xf32> -> vector<1x8x8xf32>
    "tpu.trace_stop"() : () -> ()
    %cst_17 = arith.constant dense<0xFF800000> : vector<1x8xf32>
    %37 = vector.multi_reduction <maximumf>, %36, %cst_17 [2] : vector<1x8x8xf32> to vector<1x8xf32>
    %38 = vector.shape_cast %37 : vector<1x8xf32> to vector<1x8x1xf32>
    %39 = vector.broadcast %38 : vector<1x8x1xf32> to vector<1x8x8xf32>
    %40 = arith.subf %36, %39 : vector<1x8x8xf32>
    %41 = math.exp %40 : vector<1x8x8xf32>
    %cst_18 = arith.constant dense<0.000000e+00> : vector<1x8xf32>
    %42 = vector.multi_reduction <add>, %41, %cst_18 [2] : vector<1x8x8xf32> to vector<1x8xf32>
    %43 = vector.shape_cast %42 : vector<1x8xf32> to vector<1x8x1xf32>
    "tpu.trace_start"() <{level = 10 : i32, message = "bqk,bkd->bqd"}> : () -> ()
    %cst_19 = arith.constant dense<0.000000e+00> : vector<1x8x8xf32>
    %44 = tpu.matmul %41, %35, %cst_19 {dimension_numbers = #tpu.dot_dimension_numbers<[2], [1], [1], [2], [0, 0, 0, 1, 1, 2], [0], [0]>} : vector<1x8x8xf32>, vector<1x8x8xf32>, vector<1x8x8xf32> -> vector<1x8x8xf32>
    "tpu.trace_stop"() : () -> ()
    %45 = tpu.reciprocal %43 {approx = true} : vector<1x8x1xf32> -> vector<1x8x1xf32>
    %46 = vector.broadcast %45 : vector<1x8x1xf32> to vector<1x8x8xf32>
    %47 = arith.mulf %44, %46 : vector<1x8x8xf32>
    %48 = vector.shape_cast %47 : vector<1x8x8xf32> to vector<8x8xf32>
    %c0_20 = arith.constant 0 : index
    %c0_21 = arith.constant 0 : index
    %c0_22 = arith.constant 0 : index
    %49 = vector.load %arg6[%c0_20, %c0_21, %c0_22] : memref<4x8x32xf32, #tpu.memory_space<vmem>>, vector<1x8x32xf32>
    %50 = vector.shape_cast %49 : vector<1x8x32xf32> to vector<8x32xf32>
    %cst_23 = arith.constant dense<0.000000e+00> : vector<8x32xf32>
    %51 = tpu.matmul %48, %50, %cst_23 {dimension_numbers = #tpu.dot_dimension_numbers<[1], [0], [0], [1], [0, 0, 1, 1], [], []>} : vector<8x8xf32>, vector<8x32xf32>, vector<8x32xf32> -> vector<8x32xf32>
    %52 = arith.addf %32, %51 : vector<8x32xf32>
    %53 = vector.extract_strided_slice %31 {offsets = [0, 0, 8], sizes = [1, 8, 8], strides = [1, 1, 1]} : vector<1x8x96xf32> to vector<1x8x8xf32>
    %54 = vector.extract_strided_slice %31 {offsets = [0, 0, 40], sizes = [1, 8, 8], strides = [1, 1, 1]} : vector<1x8x96xf32> to vector<1x8x8xf32>
    %55 = vector.extract_strided_slice %31 {offsets = [0, 0, 72], sizes = [1, 8, 8], strides = [1, 1, 1]} : vector<1x8x96xf32> to vector<1x8x8xf32>
    "tpu.trace_start"() <{level = 10 : i32, message = "bqd,bkd->bqk"}> : () -> ()
    %cst_24 = arith.constant dense<0.000000e+00> : vector<1x8x8xf32>
    %56 = tpu.matmul %53, %54, %cst_24 {dimension_numbers = #tpu.dot_dimension_numbers<[2], [2], [1], [1], [0, 0, 0, 1, 1, 1], [0], [0]>} : vector<1x8x8xf32>, vector<1x8x8xf32>, vector<1x8x8xf32> -> vector<1x8x8xf32>
    "tpu.trace_stop"() : () -> ()
    %cst_25 = arith.constant dense<0xFF800000> : vector<1x8xf32>
    %57 = vector.multi_reduction <maximumf>, %56, %cst_25 [2] : vector<1x8x8xf32> to vector<1x8xf32>
    %58 = vector.shape_cast %57 : vector<1x8xf32> to vector<1x8x1xf32>
    %59 = vector.broadcast %58 : vector<1x8x1xf32> to vector<1x8x8xf32>
    %60 = arith.subf %56, %59 : vector<1x8x8xf32>
    %61 = math.exp %60 : vector<1x8x8xf32>
    %cst_26 = arith.constant dense<0.000000e+00> : vector<1x8xf32>
    %62 = vector.multi_reduction <add>, %61, %cst_26 [2] : vector<1x8x8xf32> to vector<1x8xf32>
    %63 = vector.shape_cast %62 : vector<1x8xf32> to vector<1x8x1xf32>
    "tpu.trace_start"() <{level = 10 : i32, message = "bqk,bkd->bqd"}> : () -> ()
    %cst_27 = arith.constant dense<0.000000e+00> : vector<1x8x8xf32>
    %64 = tpu.matmul %61, %55, %cst_27 {dimension_numbers = #tpu.dot_dimension_numbers<[2], [1], [1], [2], [0, 0, 0, 1, 1, 2], [0], [0]>} : vector<1x8x8xf32>, vector<1x8x8xf32>, vector<1x8x8xf32> -> vector<1x8x8xf32>
    "tpu.trace_stop"() : () -> ()
    %65 = tpu.reciprocal %63 {approx = true} : vector<1x8x1xf32> -> vector<1x8x1xf32>
    %66 = vector.broadcast %65 : vector<1x8x1xf32> to vector<1x8x8xf32>
    %67 = arith.mulf %64, %66 : vector<1x8x8xf32>
    %68 = vector.shape_cast %67 : vector<1x8x8xf32> to vector<8x8xf32>
    %c1 = arith.constant 1 : index
    %c0_28 = arith.constant 0 : index
    %c0_29 = arith.constant 0 : index
    %69 = vector.load %arg6[%c1, %c0_28, %c0_29] : memref<4x8x32xf32, #tpu.memory_space<vmem>>, vector<1x8x32xf32>
    %70 = vector.shape_cast %69 : vector<1x8x32xf32> to vector<8x32xf32>
    %cst_30 = arith.constant dense<0.000000e+00> : vector<8x32xf32>
    %71 = tpu.matmul %68, %70, %cst_30 {dimension_numbers = #tpu.dot_dimension_numbers<[1], [0], [0], [1], [0, 0, 1, 1], [], []>} : vector<8x8xf32>, vector<8x32xf32>, vector<8x32xf32> -> vector<8x32xf32>
    %72 = arith.addf %52, %71 : vector<8x32xf32>
    %73 = vector.extract_strided_slice %31 {offsets = [0, 0, 16], sizes = [1, 8, 8], strides = [1, 1, 1]} : vector<1x8x96xf32> to vector<1x8x8xf32>
    %74 = vector.extract_strided_slice %31 {offsets = [0, 0, 48], sizes = [1, 8, 8], strides = [1, 1, 1]} : vector<1x8x96xf32> to vector<1x8x8xf32>
    %75 = vector.extract_strided_slice %31 {offsets = [0, 0, 80], sizes = [1, 8, 8], strides = [1, 1, 1]} : vector<1x8x96xf32> to vector<1x8x8xf32>
    "tpu.trace_start"() <{level = 10 : i32, message = "bqd,bkd->bqk"}> : () -> ()
    %cst_31 = arith.constant dense<0.000000e+00> : vector<1x8x8xf32>
    %76 = tpu.matmul %73, %74, %cst_31 {dimension_numbers = #tpu.dot_dimension_numbers<[2], [2], [1], [1], [0, 0, 0, 1, 1, 1], [0], [0]>} : vector<1x8x8xf32>, vector<1x8x8xf32>, vector<1x8x8xf32> -> vector<1x8x8xf32>
    "tpu.trace_stop"() : () -> ()
    %cst_32 = arith.constant dense<0xFF800000> : vector<1x8xf32>
    %77 = vector.multi_reduction <maximumf>, %76, %cst_32 [2] : vector<1x8x8xf32> to vector<1x8xf32>
    %78 = vector.shape_cast %77 : vector<1x8xf32> to vector<1x8x1xf32>
    %79 = vector.broadcast %78 : vector<1x8x1xf32> to vector<1x8x8xf32>
    %80 = arith.subf %76, %79 : vector<1x8x8xf32>
    %81 = math.exp %80 : vector<1x8x8xf32>
    %cst_33 = arith.constant dense<0.000000e+00> : vector<1x8xf32>
    %82 = vector.multi_reduction <add>, %81, %cst_33 [2] : vector<1x8x8xf32> to vector<1x8xf32>
    %83 = vector.shape_cast %82 : vector<1x8xf32> to vector<1x8x1xf32>
    "tpu.trace_start"() <{level = 10 : i32, message = "bqk,bkd->bqd"}> : () -> ()
    %cst_34 = arith.constant dense<0.000000e+00> : vector<1x8x8xf32>
    %84 = tpu.matmul %81, %75, %cst_34 {dimension_numbers = #tpu.dot_dimension_numbers<[2], [1], [1], [2], [0, 0, 0, 1, 1, 2], [0], [0]>} : vector<1x8x8xf32>, vector<1x8x8xf32>, vector<1x8x8xf32> -> vector<1x8x8xf32>
    "tpu.trace_stop"() : () -> ()
    %85 = tpu.reciprocal %83 {approx = true} : vector<1x8x1xf32> -> vector<1x8x1xf32>
    %86 = vector.broadcast %85 : vector<1x8x1xf32> to vector<1x8x8xf32>
    %87 = arith.mulf %84, %86 : vector<1x8x8xf32>
    %88 = vector.shape_cast %87 : vector<1x8x8xf32> to vector<8x8xf32>
    %c2 = arith.constant 2 : index
    %c0_35 = arith.constant 0 : index
    %c0_36 = arith.constant 0 : index
    %89 = vector.load %arg6[%c2, %c0_35, %c0_36] : memref<4x8x32xf32, #tpu.memory_space<vmem>>, vector<1x8x32xf32>
    %90 = vector.shape_cast %89 : vector<1x8x32xf32> to vector<8x32xf32>
    %cst_37 = arith.constant dense<0.000000e+00> : vector<8x32xf32>
    %91 = tpu.matmul %88, %90, %cst_37 {dimension_numbers = #tpu.dot_dimension_numbers<[1], [0], [0], [1], [0, 0, 1, 1], [], []>} : vector<8x8xf32>, vector<8x32xf32>, vector<8x32xf32> -> vector<8x32xf32>
    %92 = arith.addf %72, %91 : vector<8x32xf32>
    %93 = vector.extract_strided_slice %31 {offsets = [0, 0, 24], sizes = [1, 8, 8], strides = [1, 1, 1]} : vector<1x8x96xf32> to vector<1x8x8xf32>
    %94 = vector.extract_strided_slice %31 {offsets = [0, 0, 56], sizes = [1, 8, 8], strides = [1, 1, 1]} : vector<1x8x96xf32> to vector<1x8x8xf32>
    %95 = vector.extract_strided_slice %31 {offsets = [0, 0, 88], sizes = [1, 8, 8], strides = [1, 1, 1]} : vector<1x8x96xf32> to vector<1x8x8xf32>
    "tpu.trace_start"() <{level = 10 : i32, message = "bqd,bkd->bqk"}> : () -> ()
    %cst_38 = arith.constant dense<0.000000e+00> : vector<1x8x8xf32>
    %96 = tpu.matmul %93, %94, %cst_38 {dimension_numbers = #tpu.dot_dimension_numbers<[2], [2], [1], [1], [0, 0, 0, 1, 1, 1], [0], [0]>} : vector<1x8x8xf32>, vector<1x8x8xf32>, vector<1x8x8xf32> -> vector<1x8x8xf32>
    "tpu.trace_stop"() : () -> ()
    %cst_39 = arith.constant dense<0xFF800000> : vector<1x8xf32>
    %97 = vector.multi_reduction <maximumf>, %96, %cst_39 [2] : vector<1x8x8xf32> to vector<1x8xf32>
    %98 = vector.shape_cast %97 : vector<1x8xf32> to vector<1x8x1xf32>
    %99 = vector.broadcast %98 : vector<1x8x1xf32> to vector<1x8x8xf32>
    %100 = arith.subf %96, %99 : vector<1x8x8xf32>
    %101 = math.exp %100 : vector<1x8x8xf32>
    %cst_40 = arith.constant dense<0.000000e+00> : vector<1x8xf32>
    %102 = vector.multi_reduction <add>, %101, %cst_40 [2] : vector<1x8x8xf32> to vector<1x8xf32>
    %103 = vector.shape_cast %102 : vector<1x8xf32> to vector<1x8x1xf32>
    "tpu.trace_start"() <{level = 10 : i32, message = "bqk,bkd->bqd"}> : () -> ()
    %cst_41 = arith.constant dense<0.000000e+00> : vector<1x8x8xf32>
    %104 = tpu.matmul %101, %95, %cst_41 {dimension_numbers = #tpu.dot_dimension_numbers<[2], [1], [1], [2], [0, 0, 0, 1, 1, 2], [0], [0]>} : vector<1x8x8xf32>, vector<1x8x8xf32>, vector<1x8x8xf32> -> vector<1x8x8xf32>
    "tpu.trace_stop"() : () -> ()
    %105 = tpu.reciprocal %103 {approx = true} : vector<1x8x1xf32> -> vector<1x8x1xf32>
    %106 = vector.broadcast %105 : vector<1x8x1xf32> to vector<1x8x8xf32>
    %107 = arith.mulf %104, %106 : vector<1x8x8xf32>
    %108 = vector.shape_cast %107 : vector<1x8x8xf32> to vector<8x8xf32>
    %c3 = arith.constant 3 : index
    %c0_42 = arith.constant 0 : index
    %c0_43 = arith.constant 0 : index
    %109 = vector.load %arg6[%c3, %c0_42, %c0_43] : memref<4x8x32xf32, #tpu.memory_space<vmem>>, vector<1x8x32xf32>
    %110 = vector.shape_cast %109 : vector<1x8x32xf32> to vector<8x32xf32>
    %cst_44 = arith.constant dense<0.000000e+00> : vector<8x32xf32>
    %111 = tpu.matmul %108, %110, %cst_44 {dimension_numbers = #tpu.dot_dimension_numbers<[1], [0], [0], [1], [0, 0, 1, 1], [], []>} : vector<8x8xf32>, vector<8x32xf32>, vector<8x32xf32> -> vector<8x32xf32>
    %112 = arith.addf %92, %111 : vector<8x32xf32>
    %c0_45 = arith.constant 0 : index
    %c0_46 = arith.constant 0 : index
    %113 = vector.load %arg7[%c0_45, %c0_46] : memref<1x32xf32, #tpu.memory_space<vmem>>, vector<1x32xf32>
    %114 = vector.broadcast %113 : vector<1x32xf32> to vector<8x32xf32>
    %115 = arith.addf %112, %114 : vector<8x32xf32>
    %116 = vector.shape_cast %115 : vector<8x32xf32> to vector<1x8x32xf32>
    %117 = arith.addf %0, %116 : vector<1x8x32xf32>
    %c0_47 = arith.constant 0 : index
    %c0_48 = arith.constant 0 : index
    %118 = vector.load %arg8[%c0_47, %c0_48] : memref<1x32xf32, #tpu.memory_space<vmem>>, vector<1x32xf32>
    %c0_49 = arith.constant 0 : index
    %c0_50 = arith.constant 0 : index
    %119 = vector.load %arg9[%c0_49, %c0_50] : memref<1x32xf32, #tpu.memory_space<vmem>>, vector<1x32xf32>
    %cst_51 = arith.constant dense<0.000000e+00> : vector<1x8xf32>
    %120 = vector.multi_reduction <add>, %117, %cst_51 [2] : vector<1x8x32xf32> to vector<1x8xf32>
    %121 = vector.shape_cast %120 : vector<1x8xf32> to vector<1x8x1xf32>
    %cst_52 = arith.constant 3.200000e+01 : f32
    %122 = vector.broadcast %cst_52 : f32 to vector<1x8x1xf32>
    %123 = arith.divf %121, %122 : vector<1x8x1xf32>
    %124 = vector.broadcast %123 : vector<1x8x1xf32> to vector<1x8x32xf32>
    %125 = arith.subf %117, %124 : vector<1x8x32xf32>
    %126 = arith.mulf %125, %125 : vector<1x8x32xf32>
    %cst_53 = arith.constant dense<0.000000e+00> : vector<1x8xf32>
    %127 = vector.multi_reduction <add>, %126, %cst_53 [2] : vector<1x8x32xf32> to vector<1x8xf32>
    %128 = vector.shape_cast %127 : vector<1x8xf32> to vector<1x8x1xf32>
    %cst_54 = arith.constant 3.200000e+01 : f32
    %129 = vector.broadcast %cst_54 : f32 to vector<1x8x1xf32>
    %130 = arith.divf %128, %129 : vector<1x8x1xf32>
    %cst_55 = arith.constant 9.99999974E-6 : f32
    %131 = vector.broadcast %cst_55 : f32 to vector<1x8x1xf32>
    %132 = arith.addf %130, %131 : vector<1x8x1xf32>
    %133 = math.rsqrt %132 : vector<1x8x1xf32>
    %134 = vector.broadcast %133 : vector<1x8x1xf32> to vector<1x8x32xf32>
    %135 = arith.mulf %125, %134 : vector<1x8x32xf32>
    %136 = vector.shape_cast %118 : vector<1x32xf32> to vector<1x1x32xf32>
    %137 = vector.broadcast %136 : vector<1x1x32xf32> to vector<1x8x32xf32>
    %138 = arith.mulf %135, %137 : vector<1x8x32xf32>
    %139 = vector.shape_cast %119 : vector<1x32xf32> to vector<1x1x32xf32>
    %140 = vector.broadcast %139 : vector<1x1x32xf32> to vector<1x8x32xf32>
    %141 = arith.addf %138, %140 : vector<1x8x32xf32>
    %142 = vector.shape_cast %141 : vector<1x8x32xf32> to vector<8x32xf32>
    %c0_56 = arith.constant 0 : index
    %c0_57 = arith.constant 0 : index
    %143 = vector.load %arg10[%c0_56, %c0_57] : memref<32x128xf32, #tpu.memory_space<vmem>>, vector<32x128xf32>
    %cst_58 = arith.constant dense<0.000000e+00> : vector<8x128xf32>
    %144 = tpu.matmul %142, %143, %cst_58 {dimension_numbers = #tpu.dot_dimension_numbers<[1], [0], [0], [1], [0, 0, 1, 1], [], []>} : vector<8x32xf32>, vector<32x128xf32>, vector<8x128xf32> -> vector<8x128xf32>
    %c0_59 = arith.constant 0 : index
    %c0_60 = arith.constant 0 : index
    %145 = vector.load %arg11[%c0_59, %c0_60] : memref<1x128xf32, #tpu.memory_space<vmem>>, vector<1x128xf32>
    %146 = vector.broadcast %145 : vector<1x128xf32> to vector<8x128xf32>
    %147 = arith.addf %144, %146 : vector<8x128xf32>
    %cst_61 = arith.constant 1.702000e+00 : f32
    %148 = vector.broadcast %cst_61 : f32 to vector<8x128xf32>
    %149 = arith.mulf %148, %147 : vector<8x128xf32>
    %150 = arith.negf %149 : vector<8x128xf32>
    %151 = math.exp %150 : vector<8x128xf32>
    %cst_62 = arith.constant 1.000000e+00 : f32
    %152 = vector.broadcast %cst_62 : f32 to vector<8x128xf32>
    %153 = arith.addf %152, %151 : vector<8x128xf32>
    %154 = arith.divf %152, %153 : vector<8x128xf32>
    %155 = arith.mulf %147, %154 : vector<8x128xf32>
    %c0_63 = arith.constant 0 : index
    %c0_64 = arith.constant 0 : index
    %156 = vector.load %arg12[%c0_63, %c0_64] : memref<128x32xf32, #tpu.memory_space<vmem>>, vector<128x32xf32>
    %cst_65 = arith.constant dense<0.000000e+00> : vector<8x32xf32>
    %157 = tpu.matmul %155, %156, %cst_65 {dimension_numbers = #tpu.dot_dimension_numbers<[1], [0], [0], [1], [0, 0, 1, 1], [], []>} : vector<8x128xf32>, vector<128x32xf32>, vector<8x32xf32> -> vector<8x32xf32>
    %c0_66 = arith.constant 0 : index
    %c0_67 = arith.constant 0 : index
    %158 = vector.load %arg13[%c0_66, %c0_67] : memref<1x32xf32, #tpu.memory_space<vmem>>, vector<1x32xf32>
    %159 = vector.broadcast %158 : vector<1x32xf32> to vector<8x32xf32>
    %160 = arith.addf %157, %159 : vector<8x32xf32>
    %161 = vector.shape_cast %160 : vector<8x32xf32> to vector<1x8x32xf32>
    %162 = arith.addf %117, %161 : vector<1x8x32xf32>
    %c0_68 = arith.constant 0 : index
    %c0_69 = arith.constant 0 : index
    %c0_70 = arith.constant 0 : index
    %163 = vector.load %arg14[%c0_68, %c0_69, %c0_70] : memref<1x8x32xf32, #tpu.memory_space<vmem>>, vector<1x8x32xf32>
    tpu.vector_store %arg14[%c0_68, %c0_69, %c0_70], %162 {strides = array<i32>} : memref<1x8x32xf32, #tpu.memory_space<vmem>>, vector<1x8x32xf32>,
    return
  }
  func.func @transform_0(%arg0: i32) -> (i32, i32, i32) {
    %c0_i32 = arith.constant 0 : i32
    %c0_i32_0 = arith.constant 0 : i32
    %c0_i32_1 = arith.constant 0 : i32
    return %arg0, %c0_i32, %c0_i32_0 : i32, i32, i32
  }
  func.func @transform_1(%arg0: i32) -> (i32, i32) {
    %c0_i32 = arith.constant 0 : i32
    %c0_i32_0 = arith.constant 0 : i32
    %c0_i32_1 = arith.constant 0 : i32
    return %c0_i32, %c0_i32_0 : i32, i32
  }
  func.func @transform_2(%arg0: i32) -> (i32, i32) {
    %c0_i32 = arith.constant 0 : i32
    %c0_i32_0 = arith.constant 0 : i32
    %c0_i32_1 = arith.constant 0 : i32
    return %c0_i32, %c0_i32_0 : i32, i32
  }
  func.func @transform_3(%arg0: i32) -> (i32, i32) {
    %c0_i32 = arith.constant 0 : i32
    %c0_i32_0 = arith.constant 0 : i32
    %c0_i32_1 = arith.constant 0 : i32
    return %c0_i32, %c0_i32_0 : i32, i32
  }
  func.func @transform_4(%arg0: i32) -> (i32, i32) {
    %c0_i32 = arith.constant 0 : i32
    %c0_i32_0 = arith.constant 0 : i32
    %c0_i32_1 = arith.constant 0 : i32
    return %c0_i32, %c0_i32_0 : i32, i32
  }
  func.func @transform_5(%arg0: i32) -> (i32, i32, i32) {
    %c0_i32 = arith.constant 0 : i32
    %c0_i32_0 = arith.constant 0 : i32
    %c0_i32_1 = arith.constant 0 : i32
    %c0_i32_2 = arith.constant 0 : i32
    return %c0_i32, %c0_i32_0, %c0_i32_1 : i32, i32, i32
  }
  func.func @transform_6(%arg0: i32) -> (i32, i32) {
    %c0_i32 = arith.constant 0 : i32
    %c0_i32_0 = arith.constant 0 : i32
    %c0_i32_1 = arith.constant 0 : i32
    return %c0_i32, %c0_i32_0 : i32, i32
  }
  func.func @transform_7(%arg0: i32) -> (i32, i32) {
    %c0_i32 = arith.constant 0 : i32
    %c0_i32_0 = arith.constant 0 : i32
    %c0_i32_1 = arith.constant 0 : i32
    return %c0_i32, %c0_i32_0 : i32, i32
  }
  func.func @transform_8(%arg0: i32) -> (i32, i32) {
    %c0_i32 = arith.constant 0 : i32
    %c0_i32_0 = arith.constant 0 : i32
    %c0_i32_1 = arith.constant 0 : i32
    return %c0_i32, %c0_i32_0 : i32, i32
  }
  func.func @transform_9(%arg0: i32) -> (i32, i32) {
    %c0_i32 = arith.constant 0 : i32
    %c0_i32_0 = arith.constant 0 : i32
    %c0_i32_1 = arith.constant 0 : i32
    return %c0_i32, %c0_i32_0 : i32, i32
  }
  func.func @transform_10(%arg0: i32) -> (i32, i32) {
    %c0_i32 = arith.constant 0 : i32
    %c0_i32_0 = arith.constant 0 : i32
    %c0_i32_1 = arith.constant 0 : i32
    return %c0_i32, %c0_i32_0 : i32, i32
  }
  func.func @transform_11(%arg0: i32) -> (i32, i32) {
    %c0_i32 = arith.constant 0 : i32
    %c0_i32_0 = arith.constant 0 : i32
    %c0_i32_1 = arith.constant 0 : i32
    return %c0_i32, %c0_i32_0 : i32, i32
  }
  func.func @transform_12(%arg0: i32) -> (i32, i32) {
    %c0_i32 = arith.constant 0 : i32
    %c0_i32_0 = arith.constant 0 : i32
    %c0_i32_1 = arith.constant 0 : i32
    return %c0_i32, %c0_i32_0 : i32, i32
  }
  func.func @transform_13(%arg0: i32) -> (i32, i32, i32) {
    %c0_i32 = arith.constant 0 : i32
    %c0_i32_0 = arith.constant 0 : i32
    %c0_i32_1 = arith.constant 0 : i32
    return %arg0, %c0_i32, %c0_i32_0 : i32, i32, i32
  }
}

module attributes {stable_mosaic.version = 11 : i64} {
  func.func @_rab_kernel(%arg0: i32, %arg1: memref<1x8x32xf32, #tpu.memory_space<vmem>>, %arg2: memref<1x32xf32, #tpu.memory_space<vmem>>, %arg3: memref<1x32xf32, #tpu.memory_space<vmem>>, %arg4: memref<32x96xf32, #tpu.memory_space<vmem>>, %arg5: memref<1x96xf32, #tpu.memory_space<vmem>>, %arg6: memref<4x8x32xf32, #tpu.memory_space<vmem>>, %arg7: memref<1x32xf32, #tpu.memory_space<vmem>>, %arg8: memref<1x32xf32, #tpu.memory_space<vmem>>, %arg9: memref<1x32xf32, #tpu.memory_space<vmem>>, %arg10: memref<32x128xf32, #tpu.memory_space<vmem>>, %arg11: memref<1x128xf32, #tpu.memory_space<vmem>>, %arg12: memref<128x32xf32, #tpu.memory_space<vmem>>, %arg13: memref<1x32xf32, #tpu.memory_space<vmem>>, %arg14: memref<1x8x32xf32, #tpu.memory_space<vmem>>) attributes {dimension_semantics = [#tpu.dimension_semantics<parallel>], iteration_bounds = array<i64: 2>, scalar_prefetch = 0 : i64, scratch_operands = 0 : i64, tpu.core_type = #tpu.core_type<tc>, window_params = [{transform_indices = @transform_0, window_bounds = array<i64: 1, 8, 32>}, {pipeline_mode = #tpu.pipeline_mode<synchronous>, transform_indices = @transform_1, window_bounds = array<i64: 1, 32>}, {pipeline_mode = #tpu.pipeline_mode<synchronous>, transform_indices = @transform_2, window_bounds = array<i64: 1, 32>}, {pipeline_mode = #tpu.pipeline_mode<synchronous>, transform_indices = @transform_3, window_bounds = array<i64: 32, 96>}, {pipeline_mode = #tpu.pipeline_mode<synchronous>, transform_indices = @transform_4, window_bounds = array<i64: 1, 96>}, {pipeline_mode = #tpu.pipeline_mode<synchronous>, transform_indices = @transform_5, window_bounds = array<i64: 4, 8, 32>}, {pipeline_mode = #tpu.pipeline_mode<synchronous>, transform_indices = @transform_6, window_bounds = array<i64: 1, 32>}, {pipeline_mode = #tpu.pipeline_mode<synchronous>, transform_indices = @transform_7, window_bounds = array<i64: 1, 32>}, {pipeline_mode = #tpu.pipeline_mode<synchronous>, transform_indices = @transform_8, window_bounds = array<i64: 1, 32>}, {pipeline_mode = #tpu.pipeline_mode<synchronous>, transform_indices = @transform_9, window_bounds = array<i64: 32, 128>}, {pipeline_mode = #tpu.pipeline_mode<synchronous>, transform_indices = @transform_10, window_bounds = array<i64: 1, 128>}, {pipeline_mode = #tpu.pipeline_mode<synchronous>, transform_indices = @transform_11, window_bounds = array<i64: 128, 32>}, {pipeline_mode = #tpu.pipeline_mode<synchronous>, transform_indices = @transform_12, window_bounds = array<i64: 1, 32>}, {transform_indices = @transform_13, window_bounds = array<i64: 1, 8, 32>}]} {
    %c0 = arith.constant 0 : index
    %c0_0 = arith.constant 0 : index
    %c0_1 = arith.constant 0 : index
    %0 = vector.load %arg1[%c0, %c0_0, %c0_1] : memref<1x8x32xf32, #tpu.memory_space<vmem>>, vector<1x8x32xf32>
    %c0_2 = arith.constant 0 : index
    %c0_3 = arith.constant 0 : index
    %1 = vector.load %arg2[%c0_2, %c0_3] : memref<1x32xf32, #tpu.memory_space<vmem>>, vector<1x32xf32>
    %c0_4 = arith.constant 0 : index
    %c0_5 = arith.constant 0 : index
    %2 = vector.load %arg3[%c0_4, %c0_5] : memref<1x32xf32, #tpu.memory_space<vmem>>, vector<1x32xf32>
    %cst = arith.constant dense<0.000000e+00> : vector<1x8xf32>
    %3 = vector.multi_reduction <add>, %0, %cst [2] : vector<1x8x32xf32> to vector<1x8xf32>
    %4 = vector.shape_cast %3 : vector<1x8xf32> to vector<1x8x1xf32>
    %cst_6 = arith.constant 3.200000e+01 : f32
    %5 = vector.broadcast %cst_6 : f32 to vector<1x8x1xf32>
    %6 = arith.divf %4, %5 : vector<1x8x1xf32>
    %7 = vector.broadcast %6 : vector<1x8x1xf32> to vector<1x8x32xf32>
    %8 = arith.subf %0, %7 : vector<1x8x32xf32>
    %9 = arith.mulf %8, %8 : vector<1x8x32xf32>
    %cst_7 = arith.constant dense<0.000000e+00> : vector<1x8xf32>
    %10 = vector.multi_reduction <add>, %9, %cst_7 [2] : vector<1x8x32xf32> to vector<1x8xf32>
    %11 = vector.shape_cast %10 : vector<1x8xf32> to vector<1x8x1xf32>
    %cst_8 = arith.constant 3.200000e+01 : f32
    %12 = vector.broadcast %cst_8 : f32 to vector<1x8x1xf32>
    %13 = arith.divf %11, %12 : vector<1x8x1xf32>
    %cst_9 = arith.constant 9.99999974E-6 : f32
    %14 = vector.broadcast %cst_9 : f32 to vector<1x8x1xf32>
    %15 = arith.addf %13, %14 : vector<1x8x1xf32>
    %16 = math.rsqrt %15 : vector<1x8x1xf32>
    %17 = vector.broadcast %16 : vector<1x8x1xf32> to vector<1x8x32xf32>
    %18 = arith.mulf %8, %17 : vector<1x8x32xf32>
    %19 = vector.shape_cast %1 : vector<1x32xf32> to vector<1x1x32xf32>
    %20 = vector.broadcast %19 : vector<1x1x32xf32> to vector<1x8x32xf32>
    %21 = arith.mulf %18, %20 : vector<1x8x32xf32>
    %22 = vector.shape_cast %2 : vector<1x32xf32> to vector<1x1x32xf32>
    %23 = vector.broadcast %22 : vector<1x1x32xf32> to vector<1x8x32xf32>
    %24 = arith.addf %21, %23 : vector<1x8x32xf32>
    %25 = vector.shape_cast %24 : vector<1x8x32xf32> to vector<8x32xf32>
    %c0_10 = arith.constant 0 : index
    %c0_11 = arith.constant 0 : index
    %26 = vector.load %arg4[%c0_10, %c0_11] : memref<32x96xf32, #tpu.memory_space<vmem>>, vector<32x96xf32>
    %cst_12 = arith.constant dense<0.000000e+00> : vector<8x96xf32>
    %27 = tpu.matmul %25, %26, %cst_12 {dimension_numbers = #tpu.dot_dimension_numbers<[1], [0], [0], [1], [0, 0, 1, 1], [], []>} : vector<8x32xf32>, vector<32x96xf32>, vector<8x96xf32> -> vector<8x96xf32>
    %c0_13 = arith.constant 0 : index
    %c0_14 = arith.constant 0 : index
    %28 = vector.load %arg5[%c0_13, %c0_14] : memref<1x96xf32, #tpu.memory_space<vmem>>, vector<1x96xf32>
    %29 = vector.broadcast %28 : vector<1x96xf32> to vector<8x96xf32>
    %30 = arith.addf %27, %29 : vector<8x96xf32>
    %31 = vector.shape_cast %30 : vector<8x96xf32> to vector<1x8x96xf32>
    %cst_15 = arith.constant 0.000000e+00 : f32
    %32 = vector.broadcast %cst_15 : f32 to vector<8x32xf32>
    %33 = vector.extract_strided_slice %31 {offsets = [0, 0, 0], sizes = [1, 8, 8], strides = [1, 1, 1]} : vector<1x8x96xf32> to vector<1x8x8xf32>
    %34 = vector.extract_strided_slice %31 {offsets = [0, 0, 32], sizes = [1, 8, 8], strides = [1, 1, 1]} : vector<1x8x96xf32> to vector<1x8x8xf32>
    %35 = vector.extract_strided_slice %31 {offsets = [0, 0, 64], sizes = [1, 8, 8], strides = [1, 1, 1]} : vector<1x8x96xf32> to vector<1x8x8xf32>
    "tpu.trace_start"() <{level = 10 : i32, message = "bqd,bkd->bqk"}> : () -> ()
    %cst_16 = arith.constant dense<0.000000e+00> : vector<1x8x8xf32>
    %36 = tpu.matmul %33, %34, %cst_16 {dimension_numbers = #tpu.dot_dimension_numbers<[2], [2], [1], [1], [0, 0, 0, 1, 1, 1], [0], [0]>} : vector<1x8x8xf32>, vector<1x8x8xf32>, vector<1x8x8xf32> -> vector<1x8x8xf32>
    "tpu.trace_stop"() : () -> ()
    %cst_17 = arith.constant dense<0xFF800000> : vector<1x8xf32>
    %37 = vector.multi_reduction <maximumf>, %36, %cst_17 [2] : vector<1x8x8xf32> to vector<1x8xf32>
    %38 = vector.shape_cast %37 : vector<1x8xf32> to vector<1x8x1xf32>
    %39 = vector.broadcast %38 : vector<1x8x1xf32> to vector<1x8x8xf32>
    %40 = arith.subf %36, %39 : vector<1x8x8xf32>
    %41 = math.exp %40 : vector<1x8x8xf32>
    %cst_18 = arith.constant dense<0.000000e+00> : vector<1x8xf32>
    %42 = vector.multi_reduction <add>, %41, %cst_18 [2] : vector<1x8x8xf32> to vector<1x8xf32>
    %43 = vector.shape_cast %42 : vector<1x8xf32> to vector<1x8x1xf32>
    "tpu.trace_start"() <{level = 10 : i32, message = "bqk,bkd->bqd"}> : () -> ()
    %cst_19 = arith.constant dense<0.000000e+00> : vector<1x8x8xf32>
    %44 = tpu.matmul %41, %35, %cst_19 {dimension_numbers = #tpu.dot_dimension_numbers<[2], [1], [1], [2], [0, 0, 0, 1, 1, 2], [0], [0]>} : vector<1x8x8xf32>, vector<1x8x8xf32>, vector<1x8x8xf32> -> vector<1x8x8xf32>
    "tpu.trace_stop"() : () -> ()
    %45 = tpu.reciprocal %43 {approx = true} : vector<1x8x1xf32> -> vector<1x8x1xf32>
    %46 = vector.broadcast %45 : vector<1x8x1xf32> to vector<1x8x8xf32>
    %47 = arith.mulf %44, %46 : vector<1x8x8xf32>
    %48 = vector.shape_cast %47 : vector<1x8x8xf32> to vector<8x8xf32>
    %c0_20 = arith.constant 0 : index
    %c0_21 = arith.constant 0 : index
    %c0_22 = arith.constant 0 : index
    %49 = vector.load %arg6[%c0_20, %c0_21, %c0_22] : memref<4x8x32xf32, #tpu.memory_space<vmem>>, vector<1x8x32xf32>
    %50 = vector.shape_cast %49 : vector<1x8x32xf32> to vector<8x32xf32>
    %cst_23 = arith.constant dense<0.000000e+00> : vector<8x32xf32>
    %51 = tpu.matmul %48, %50, %cst_23 {dimension_numbers = #tpu.dot_dimension_numbers<[1], [0], [0], [1], [0, 0, 1, 1], [], []>} : vector<8x8xf32>, vector<8x32xf32>, vector<8x32xf32> -> vector<8x32xf32>
    %52 = arith.addf %32, %51 : vector<8x32xf32>
    %53 = vector.extract_strided_slice %31 {offsets = [0, 0, 8], sizes = [1, 8, 8], strides = [1, 1, 1]} : vector<1x8x96xf32> to vector<1x8x8xf32>
    %54 = vector.extract_strided_slice %31 {offsets = [0, 0, 40], sizes = [1, 8, 8], strides = [1, 1, 1]} : vector<1x8x96xf32> to vector<1x8x8xf32>
    %55 = vector.extract_strided_slice %31 {offsets = [0, 0, 72], sizes = [1, 8, 8], strides = [1, 1, 1]} : vector<1x8x96xf32> to vector<1x8x8xf32>
    "tpu.trace_start"() <{level = 10 : i32, message = "bqd,bkd->bqk"}> : () -> ()
    %cst_24 = arith.constant dense<0.000000e+00> : vector<1x8x8xf32>
    %56 = tpu.matmul %53, %54, %cst_24 {dimension_numbers = #tpu.dot_dimension_numbers<[2], [2], [1], [1], [0, 0, 0, 1, 1, 1], [0], [0]>} : vector<1x8x8xf32>, vector<1x8x8xf32>, vector<1x8x8xf32> -> vector<1x8x8xf32>
    "tpu.trace_stop"() : () -> ()
    %cst_25 = arith.constant dense<0xFF800000> : vector<1x8xf32>
    %57 = vector.multi_reduction <maximumf>, %56, %cst_25 [2] : vector<1x8x8xf32> to vector<1x8xf32>
    %58 = vector.shape_cast %57 : vector<1x8xf32> to vector<1x8x1xf32>
    %59 = vector.broadcast %58 : vector<1x8x1xf32> to vector<1x8x8xf32>
    %60 = arith.subf %56, %59 : vector<1x8x8xf32>
    %61 = math.exp %60 : vector<1x8x8xf32>
    %cst_26 = arith.constant dense<0.000000e+00> : vector<1x8xf32>
    %62 = vector.multi_reduction <add>, %61, %cst_26 [2] : vector<1x8x8xf32> to vector<1x8xf32>
    %63 = vector.shape_cast %62 : vector<1x8xf32> to vector<1x8x1xf32>
    "tpu.trace_start"() <{level = 10 : i32, message = "bqk,bkd->bqd"}> : () -> ()
    %cst_27 = arith.constant dense<0.000000e+00> : vector<1x8x8xf32>
    %64 = tpu.matmul %61, %55, %cst_27 {dimension_numbers = #tpu.dot_dimension_numbers<[2], [1], [1], [2], [0, 0, 0, 1, 1, 2], [0], [0]>} : vector<1x8x8xf32>, vector<1x8x8xf32>, vector<1x8x8xf32> -> vector<1x8x8xf32>
    "tpu.trace_stop"() : () -> ()
    %65 = tpu.reciprocal %63 {approx = true} : vector<1x8x1xf32> -> vector<1x8x1xf32>
    %66 = vector.broadcast %65 : vector<1x8x1xf32> to vector<1x8x8xf32>
    %67 = arith.mulf %64, %66 : vector<1x8x8xf32>
    %68 = vector.shape_cast %67 : vector<1x8x8xf32> to vector<8x8xf32>
    %c1 = arith.constant 1 : index
    %c0_28 = arith.constant 0 : index
    %c0_29 = arith.constant 0 : index
    %69 = vector.load %arg6[%c1, %c0_28, %c0_29] : memref<4x8x32xf32, #tpu.memory_space<vmem>>, vector<1x8x32xf32>
    %70 = vector.shape_cast %69 : vector<1x8x32xf32> to vector<8x32xf32>
    %cst_30 = arith.constant dense<0.000000e+00> : vector<8x32xf32>
    %71 = tpu.matmul %68, %70, %cst_30 {dimension_numbers = #tpu.dot_dimension_numbers<[1], [0], [0], [1], [0, 0, 1, 1], [], []>} : vector<8x8xf32>, vector<8x32xf32>, vector<8x32xf32> -> vector<8x32xf32>
    %72 = arith.addf %52, %71 : vector<8x32xf32>
    %73 = vector.extract_strided_slice %31 {offsets = [0, 0, 16], sizes = [1, 8, 8], strides = [1, 1, 1]} : vector<1x8x96xf32> to vector<1x8x8xf32>
    %74 = vector.extract_strided_slice %31 {offsets = [0, 0, 48], sizes = [1, 8, 8], strides = [1, 1, 1]} : vector<1x8x96xf32> to vector<1x8x8xf32>
    %75 = vector.extract_strided_slice %31 {offsets = [0, 0, 80], sizes = [1, 8, 8], strides = [1, 1, 1]} : vector<1x8x96xf32> to vector<1x8x8xf32>
    "tpu.trace_start"() <{level = 10 : i32, message = "bqd,bkd->bqk"}> : () -> ()
    %cst_31 = arith.constant dense<0.000000e+00> : vector<1x8x8xf32>
    %76 = tpu.matmul %73, %74, %cst_31 {dimension_numbers = #tpu.dot_dimension_numbers<[2], [2], [1], [1], [0, 0, 0, 1, 1, 1], [0], [0]>} : vector<1x8x8xf32>, vector<1x8x8xf32>, vector<1x8x8xf32> -> vector<1x8x8xf32>
    "tpu.trace_stop"() : () -> ()
    %cst_32 = arith.constant dense<0xFF800000> : vector<1x8xf32>
    %77 = vector.multi_reduction <maximumf>, %76, %cst_32 [2] : vector<1x8x8xf32> to vector<1x8xf32>
    %78 = vector.shape_cast %77 : vector<1x8xf32> to vector<1x8x1xf32>
    %79 = vector.broadcast %78 : vector<1x8x1xf32> to vector<1x8x8xf32>
    %80 = arith.subf %76, %79 : vector<1x8x8xf32>
    %81 = math.exp %80 : vector<1x8x8xf32>
    %cst_33 = arith.constant dense<0.000000e+00> : vector<1x8xf32>
    %82 = vector.multi_reduction <add>, %81, %cst_33 [2] : vector<1x8x8xf32> to vector<1x8xf32>
    %83 = vector.shape_cast %82 : vector<1x8xf32> to vector<1x8x1xf32>
    "tpu.trace_start"() <{level = 10 : i32, message = "bqk,bkd->bqd"}> : () -> ()
    %cst_34 = arith.constant dense<0.000000e+00> : vector<1x8x8xf32>
    %84 = tpu.matmul %81, %75, %cst_34 {dimension_numbers = #tpu.dot_dimension_numbers<[2], [1], [1], [2], [0, 0, 0, 1, 1, 2], [0], [0]>} : vector<1x8x8xf32>, vector<1x8x8xf32>, vector<1x8x8xf32> -> vector<1x8x8xf32>
    "tpu.trace_stop"() : () -> ()
    %85 = tpu.reciprocal %83 {approx = true} : vector<1x8x1xf32> -> vector<1x8x1xf32>
    %86 = vector.broadcast %85 : vector<1x8x1xf32> to vector<1x8x8xf32>
    %87 = arith.mulf %84, %86 : vector<1x8x8xf32>
    %88 = vector.shape_cast %87 : vector<1x8x8xf32> to vector<8x8xf32>
    %c2 = arith.constant 2 : index
    %c0_35 = arith.constant 0 : index
    %c0_36 = arith.constant 0 : index
    %89 = vector.load %arg6[%c2, %c0_35, %c0_36] : memref<4x8x32xf32, #tpu.memory_space<vmem>>, vector<1x8x32xf32>
    %90 = vector.shape_cast %89 : vector<1x8x32xf32> to vector<8x32xf32>
    %cst_37 = arith.constant dense<0.000000e+00> : vector<8x32xf32>
    %91 = tpu.matmul %88, %90, %cst_37 {dimension_numbers = #tpu.dot_dimension_numbers<[1], [0], [0], [1], [0, 0, 1, 1], [], []>} : vector<8x8xf32>, vector<8x32xf32>, vector<8x32xf32> -> vector<8x32xf32>
    %92 = arith.addf %72, %91 : vector<8x32xf32>
    %93 = vector.extract_strided_slice %31 {offsets = [0, 0, 24], sizes = [1, 8, 8], strides = [1, 1, 1]} : vector<1x8x96xf32> to vector<1x8x8xf32>
    %94 = vector.extract_strided_slice %31 {offsets = [0, 0, 56], sizes = [1, 8, 8], strides = [1, 1, 1]} : vector<1x8x96xf32> to vector<1x8x8xf32>
    %95 = vector.extract_strided_slice %31 {offsets = [0, 0, 88], sizes = [1, 8, 8], strides = [1, 1, 1]} : vector<1x8x96xf32> to vector<1x8x8xf32>
    "tpu.trace_start"() <{level = 10 : i32, message = "bqd,bkd->bqk"}> : () -> ()
    %cst_38 = arith.constant dense<0.000000e+00> : vector<1x8x8xf32>
    %96 = tpu.matmul %93, %94, %cst_38 {dimension_numbers = #tpu.dot_dimension_numbers<[2], [2], [1], [1], [0, 0, 0, 1, 1, 1], [0], [0]>} : vector<1x8x8xf32>, vector<1x8x8xf32>, vector<1x8x8xf32> -> vector<1x8x8xf32>
    "tpu.trace_stop"() : () -> ()
    %cst_39 = arith.constant dense<0xFF800000> : vector<1x8xf32>
    %97 = vector.multi_reduction <maximumf>, %96, %cst_39 [2] : vector<1x8x8xf32> to vector<1x8xf32>
    %98 = vector.shape_cast %97 : vector<1x8xf32> to vector<1x8x1xf32>
    %99 = vector.broadcast %98 : vector<1x8x1xf32> to vector<1x8x8xf32>
    %100 = arith.subf %96, %99 : vector<1x8x8xf32>
    %101 = math.exp %100 : vector<1x8x8xf32>
    %cst_40 = arith.constant dense<0.000000e+00> : vector<1x8xf32>
    %102 = vector.multi_reduction <add>, %101, %cst_40 [2] : vector<1x8x8xf32> to vector<1x8xf32>
    %103 = vector.shape_cast %102 : vector<1x8xf32> to vector<1x8x1xf32>
    "tpu.trace_start"() <{level = 10 : i32, message = "bqk,bkd->bqd"}> : () -> ()
    %cst_41 = arith.constant dense<0.000000e+00> : vector<1x8x8xf32>
    %104 = tpu.matmul %101, %95, %cst_41 {dimension_numbers = #tpu.dot_dimension_numbers<[2], [1], [1], [2], [0, 0, 0, 1, 1, 2], [0], [0]>} : vector<1x8x8xf32>, vector<1x8x8xf32>, vector<1x8x8xf32> -> vector<1x8x8xf32>
    "tpu.trace_stop"() : () -> ()
    %105 = tpu.reciprocal %103 {approx = true} : vector<1x8x1xf32> -> vector<1x8x1xf32>
    %106 = vector.broadcast %105 : vector<1x8x1xf32> to vector<1x8x8xf32>
    %107 = arith.mulf %104, %106 : vector<1x8x8xf32>
    %108 = vector.shape_cast %107 : vector<1x8x8xf32> to vector<8x8xf32>
    %c3 = arith.constant 3 : index
    %c0_42 = arith.constant 0 : index
    %c0_43 = arith.constant 0 : index
    %109 = vector.load %arg6[%c3, %c0_42, %c0_43] : memref<4x8x32xf32, #tpu.memory_space<vmem>>, vector<1x8x32xf32>
    %110 = vector.shape_cast %109 : vector<1x8x32xf32> to vector<8x32xf32>
    %cst_44 = arith.constant dense<0.000000e+00> : vector<8x32xf32>
    %111 = tpu.matmul %108, %110, %cst_44 {dimension_numbers = #tpu.dot_dimension_numbers<[1], [0], [0], [1], [0, 0, 1, 1], [], []>} : vector<8x8xf32>, vector<8x32xf32>, vector<8x32xf32> -> vector<8x32xf32>
    %112 = arith.addf %92, %111 : vector<8x32xf32>
    %c0_45 = arith.constant 0 : index
    %c0_46 = arith.constant 0 : index
    %113 = vector.load %arg7[%c0_45, %c0_46] : memref<1x32xf32, #tpu.memory_space<vmem>>, vector<1x32xf32>
    %114 = vector.broadcast %113 : vector<1x32xf32> to vector<8x32xf32>
    %115 = arith.addf %112, %114 : vector<8x32xf32>
    %116 = vector.shape_cast %115 : vector<8x32xf32> to vector<1x8x32xf32>
    %117 = arith.addf %0, %116 : vector<1x8x32xf32>
    %c0_47 = arith.constant 0 : index
    %c0_48 = arith.constant 0 : index
    %118 = vector.load %arg8[%c0_47, %c0_48] : memref<1x32xf32, #tpu.memory_space<vmem>>, vector<1x32xf32>
    %c0_49 = arith.constant 0 : index
    %c0_50 = arith.constant 0 : index
    %119 = vector.load %arg9[%c0_49, %c0_50] : memref<1x32xf32, #tpu.memory_space<vmem>>, vector<1x32xf32>
    %cst_51 = arith.constant dense<0.000000e+00> : vector<1x8xf32>
    %120 = vector.multi_reduction <add>, %117, %cst_51 [2] : vector<1x8x32xf32> to vector<1x8xf32>
    %121 = vector.shape_cast %120 : vector<1x8xf32> to vector<1x8x1xf32>
    %cst_52 = arith.constant 3.200000e+01 : f32
    %122 = vector.broadcast %cst_52 : f32 to vector<1x8x1xf32>
    %123 = arith.divf %121, %122 : vector<1x8x1xf32>
    %124 = vector.broadcast %123 : vector<1x8x1xf32> to vector<1x8x32xf32>
    %125 = arith.subf %117, %124 : vector<1x8x32xf32>
    %126 = arith.mulf %125, %125 : vector<1x8x32xf32>
    %cst_53 = arith.constant dense<0.000000e+00> : vector<1x8xf32>
    %127 = vector.multi_reduction <add>, %126, %cst_53 [2] : vector<1x8x32xf32> to vector<1x8xf32>
    %128 = vector.shape_cast %127 : vector<1x8xf32> to vector<1x8x1xf32>
    %cst_54 = arith.constant 3.200000e+01 : f32
    %129 = vector.broadcast %cst_54 : f32 to vector<1x8x1xf32>
    %130 = arith.divf %128, %129 : vector<1x8x1xf32>
    %cst_55 = arith.constant 9.99999974E-6 : f32
    %131 = vector.broadcast %cst_55 : f32 to vector<1x8x1xf32>
    %132 = arith.addf %130, %131 : vector<1x8x1xf32>
    %133 = math.rsqrt %132 : vector<1x8x1xf32>
    %134 = vector.broadcast %133 : vector<1x8x1xf32> to vector<1x8x32xf32>
    %135 = arith.mulf %125, %134 : vector<1x8x32xf32>
    %136 = vector.shape_cast %118 : vector<1x32xf32> to vector<1x1x32xf32>
    %137 = vector.broadcast %136 : vector<1x1x32xf32> to vector<1x8x32xf32>
    %138 = arith.mulf %135, %137 : vector<1x8x32xf32>
    %139 = vector.shape_cast %119 : vector<1x32xf32> to vector<1x1x32xf32>
    %140 = vector.broadcast %139 : vector<1x1x32xf32> to vector<1x8x32xf32>
    %141 = arith.addf %138, %140 : vector<1x8x32xf32>
    %142 = vector.shape_cast %141 : vector<1x8x32xf32> to vector<8x32xf32>
    %c0_56 = arith.constant 0 : index
    %c0_57 = arith.constant 0 : index
    %143 = vector.load %arg10[%c0_56, %c0_57] : memref<32x128xf32, #tpu.memory_space<vmem>>, vector<32x128xf32>
    %cst_58 = arith.constant dense<0.000000e+00> : vector<8x128xf32>
    %144 = tpu.matmul %142, %143, %cst_58 {dimension_numbers = #tpu.dot_dimension_numbers<[1], [0], [0], [1], [0, 0, 1, 1], [], []>} : vector<8x32xf32>, vector<32x128xf32>, vector<8x128xf32> -> vector<8x128xf32>
    %c0_59 = arith.constant 0 : index
    %c0_60 = arith.constant 0 : index
    %145 = vector.load %arg11[%c0_59, %c0_60] : memref<1x128xf32, #tpu.memory_space<vmem>>, vector<1x128xf32>
    %146 = vector.broadcast %145 : vector<1x128xf32> to vector<8x128xf32>
    %147 = arith.addf %144, %146 : vector<8x128xf32>
    %cst_61 = arith.constant 1.702000e+00 : f32
    %148 = vector.broadcast %cst_61 : f32 to vector<8x128xf32>
    %149 = arith.mulf %148, %147 : vector<8x128xf32>
    %150 = arith.negf %149 : vector<8x128xf32>
    %151 = math.exp %150 : vector<8x128xf32>
    %cst_62 = arith.constant 1.000000e+00 : f32
    %152 = vector.broadcast %cst_62 : f32 to vector<8x128xf32>
    %153 = arith.addf %152, %151 : vector<8x128xf32>
    %154 = arith.divf %152, %153 : vector<8x128xf32>
    %155 = arith.mulf %147, %154 : vector<8x128xf32>
    %c0_63 = arith.constant 0 : index
    %c0_64 = arith.constant 0 : index
    %156 = vector.load %arg12[%c0_63, %c0_64] : memref<128x32xf32, #tpu.memory_space<vmem>>, vector<128x32xf32>
    %cst_65 = arith.constant dense<0.000000e+00> : vector<8x32xf32>
    %157 = tpu.matmul %155, %156, %cst_65 {dimension_numbers = #tpu.dot_dimension_numbers<[1], [0], [0], [1], [0, 0, 1, 1], [], []>} : vector<8x128xf32>, vector<128x32xf32>, vector<8x32xf32> -> vector<8x32xf32>
    %c0_66 = arith.constant 0 : index
    %c0_67 = arith.constant 0 : index
    %158 = vector.load %arg13[%c0_66, %c0_67] : memref<1x32xf32, #tpu.memory_space<vmem>>, vector<1x32xf32>
    %159 = vector.broadcast %158 : vector<1x32xf32> to vector<8x32xf32>
    %160 = arith.addf %157, %159 : vector<8x32xf32>
    %161 = vector.shape_cast %160 : vector<8x32xf32> to vector<1x8x32xf32>
    %162 = arith.addf %117, %161 : vector<1x8x32xf32>
    %c0_68 = arith.constant 0 : index
    %c0_69 = arith.constant 0 : index
    %c0_70 = arith.constant 0 : index
    %163 = vector.load %arg14[%c0_68, %c0_69, %c0_70] : memref<1x8x32xf32, #tpu.memory_space<vmem>>, vector<1x8x32xf32>
    tpu.vector_store %arg14[%c0_68, %c0_69, %c0_70], %162 {strides = array<i32>} : memref<1x8x32xf32, #tpu.memory_space<vmem>>, vector<1x8x32xf32>,
    return
  }
  func.func @transform_0(%arg0: i32) -> (i32, i32, i32) {
    %c0_i32 = arith.constant 0 : i32
    %c0_i32_0 = arith.constant 0 : i32
    %c0_i32_1 = arith.constant 0 : i32
    return %arg0, %c0_i32, %c0_i32_0 : i32, i32, i32
  }
  func.func @transform_1(%arg0: i32) -> (i32, i32) {
    %c0_i32 = arith.constant 0 : i32
    %c0_i32_0 = arith.constant 0 : i32
    %c0_i32_1 = arith.constant 0 : i32
    return %c0_i32, %c0_i32_0 : i32, i32
  }
  func.func @transform_2(%arg0: i32) -> (i32, i32) {
    %c0_i32 = arith.constant 0 : i32
    %c0_i32_0 = arith.constant 0 : i32
    %c0_i32_1 = arith.constant 0 : i32
    return %c0_i32, %c0_i32_0 : i32, i32
  }
  func.func @transform_3(%arg0: i32) -> (i32, i32) {
    %c0_i32 = arith.constant 0 : i32
    %c0_i32_0 = arith.constant 0 : i32
    %c0_i32_1 = arith.constant 0 : i32
    return %c0_i32, %c0_i32_0 : i32, i32
  }
  func.func @transform_4(%arg0: i32) -> (i32, i32) {
    %c0_i32 = arith.constant 0 : i32
    %c0_i32_0 = arith.constant 0 : i32
    %c0_i32_1 = arith.constant 0 : i32
    return %c0_i32, %c0_i32_0 : i32, i32
  }
  func.func @transform_5(%arg0: i32) -> (i32, i32, i32) {
    %c0_i32 = arith.constant 0 : i32
    %c0_i32_0 = arith.constant 0 : i32
    %c0_i32_1 = arith.constant 0 : i32
    %c0_i32_2 = arith.constant 0 : i32
    return %c0_i32, %c0_i32_0, %c0_i32_1 : i32, i32, i32
  }
  func.func @transform_6(%arg0: i32) -> (i32, i32) {
    %c0_i32 = arith.constant 0 : i32
    %c0_i32_0 = arith.constant 0 : i32
    %c0_i32_1 = arith.constant 0 : i32
    return %c0_i32, %c0_i32_0 : i32, i32
  }
  func.func @transform_7(%arg0: i32) -> (i32, i32) {
    %c0_i32 = arith.constant 0 : i32
    %c0_i32_0 = arith.constant 0 : i32
    %c0_i32_1 = arith.constant 0 : i32
    return %c0_i32, %c0_i32_0 : i32, i32
  }
  func.func @transform_8(%arg0: i32) -> (i32, i32) {
    %c0_i32 = arith.constant 0 : i32
    %c0_i32_0 = arith.constant 0 : i32
    %c0_i32_1 = arith.constant 0 : i32
    return %c0_i32, %c0_i32_0 : i32, i32
  }
  func.func @transform_9(%arg0: i32) -> (i32, i32) {
    %c0_i32 = arith.constant 0 : i32
    %c0_i32_0 = arith.constant 0 : i32
    %c0_i32_1 = arith.constant 0 : i32
    return %c0_i32, %c0_i32_0 : i32, i32
  }
  func.func @transform_10(%arg0: i32) -> (i32, i32) {
    %c0_i32 = arith.constant 0 : i32
    %c0_i32_0 = arith.constant 0 : i32
    %c0_i32_1 = arith.constant 0 : i32
    return %c0_i32, %c0_i32_0 : i32, i32
  }
  func.func @transform_11(%arg0: i32) -> (i32, i32) {
    %c0_i32 = arith.constant 0 : i32
    %c0_i32_0 = arith.constant 0 : i32
    %c0_i32_1 = arith.constant 0 : i32
    return %c0_i32, %c0_i32_0 : i32, i32
  }
  func.func @transform_12(%arg0: i32) -> (i32, i32) {
    %c0_i32 = arith.constant 0 : i32
    %c0_i32_0 = arith.constant 0 : i32
    %c0_i32_1 = arith.constant 0 : i32
    return %c0_i32, %c0_i32_0 : i32, i32
  }
  func.func @transform_13(%arg0: i32) -> (i32, i32, i32) {
    %c0_i32 = arith.constant 0 : i32
    %c0_i32_0 = arith.constant 0 : i32
    %c0_i32_1 = arith.constant 0 : i32
    return %arg0, %c0_i32, %c0_i32_0 : i32, i32, i32
  }
}

</mosaic_0001>

<bundles_post_ra>
// kernel: tpu_custom_call.1
= control target key start
LH: loop header
LB: loop body
LE: loop exit
PB: predicated region body
PF: predicated region fallthrough
CT: control target
= control target key end

     0   :  { %s1579_s0 = inlined_call_operand.vmem [shape: f32[2,8,32], index: 0, kind: input, shape index: {}]   ;;  %s1580_s1 = inlined_call_operand.vmem [shape: f32[1,32], index: 1, kind: input, shape index: {}]   ;;  %s1581_s2 = inlined_call_operand.vmem [shape: f32[1,32], index: 2, kind: input, shape index: {}]   ;;  %s1582_s3 = inlined_call_operand.vmem [shape: f32[32,96], index: 3, kind: input, shape index: {}]   ;;  %s1583_s4 = inlined_call_operand.vmem [shape: f32[1,96], index: 4, kind: input, shape index: {}]   ;;  %s1584_s5 = inlined_call_operand.vmem [shape: f32[4,8,32], index: 5, kind: input, shape index: {}]   ;;  %s1585_s6 = inlined_call_operand.vmem [shape: f32[1,32], index: 6, kind: input, shape index: {}]   ;;  %s1586_s7 = inlined_call_operand.vmem [shape: f32[1,32], index: 7, kind: input, shape index: {}]   ;;  %s1587_s8 = inlined_call_operand.vmem [shape: f32[1,32], index: 8, kind: input, shape index: {}]   ;;  %s1588_s9 = inlined_call_operand.vmem [shape: f32[32,128], index: 9, kind: input, shape index: {}]   ;;  %s1589_s10 = inlined_call_operand.vmem [shape: f32[1,128], index: 10, kind: input, shape index: {}]   ;;  %s1590_s11 = inlined_call_operand.vmem [shape: f32[128,32], index: 11, kind: input, shape index: {}]   ;;  %s1591_s12 = inlined_call_operand.vmem [shape: f32[1,32], index: 12, kind: input, shape index: {}]   ;;  %s1592_s13 = inlined_call_operand.hbm [shape: f32[2,8,32], index: 13, kind: output, shape index: {}]  }
   0x1   :  { %1593 = sst [smem:[#allocation5_spill]] %s1579_s0 }
   0x2   :  { %1594 = sst [smem:[#allocation6_spill]] %s1580_s1 }
   0x3   :  { %1595 = sst [smem:[#allocation7_spill]] %s1581_s2 }
   0x4   :  { %1596 = sst [smem:[#allocation8_spill]] %s1582_s3 }
   0x5   :  { %18 = vsyncpa [#allocation3], 0 }
   0x6   :  { %20 = vsyncpa [#allocation3 + $0x1], 0  ;;  %s1339_s25 = smov 0   ;;  %s1341_s26 = smov 0  }
   0x7   :  { %s1343_s27 = smov 0   ;;  %s1345_s28 = smov 0  }
   0x8 LB: > { %s1360_s29 = sadd.s32 4294967295, %s1255_s28   ;;  %s1076_s30 = sadd.s32 4294967294, %s1255_s28   ;;  %s1255_s28 = sphi %s1345_s28, %s1606_s28   ;;  %s1251_s27 = sphi %s1343_s27, %s1605_s27   ;;  %s1247_s26 = sphi %s1341_s26, %s1604_s26   ;;  %s1243_s25 = sphi %s1339_s25, %s1603_s25  }
   0x9   : > { %s1364_s14 = sadd.s32 1, %s1255_s28   ;;  %s311_s15 = sadd.s32 1, %s1251_s27 }
   0xa   : > { %s308_s16 = ssub.s32 %s1255_s28, %s1364_s14  ;;  %p321_p0 = scmp.ne.s32.totalorder %s1251_s27, %s1247_s26 }
   0xb   : > { %p309_p1 = scmp.eq.s32.totalorder %s308_s16, 0  ;;  %p322_p2 = scmp.eq.s32.totalorder %s1360_s29, 1 }
   0xc   : > { %p327_p3 = scmp.ne.s32.totalorder %s1247_s26, %s1243_s25  ;;  %p328_p4 = scmp.eq.s32.totalorder %s1076_s30, 1 }
   0xd   : > { %s1375_s17 = scalar_select %p309_p1, %s1251_s27, %s311_s15  }
   0xe   : > { %p1377_p5 = por %p322_p2, %p321_p0  ;;  %p1381_p6 = por %p328_p4, %p327_p3 }
   0xf   : > { %p1079_p7 = scmp.ge.s32.totalorder %s1255_s28, 1  ;;  %p389_p8 = scmp.lt.s32.totalorder %s1255_s28, 3 }
  0x11   : > { %p390_p9 = pnand %p1079_p7, %p389_p8 }
  0x12   : > { %p432_p10 = scmp.lt.s32.totalorder (!%p390_p9), %s1360_s29, 1  ;;  %s1599_s0 = sld [smem:[#allocation5_spill]] (!%p390_p9) }
  0x13   : > { %393 = sbr.rel (%p390_p9) target bundleno = 1915 (0x77b), region = 72  ;;  %s1600_s3 = sld [smem:[#allocation8_spill]] (!%p390_p9) }
  0x14   : > { %s1601_s1 = sld [smem:[#allocation6_spill]] (!%p390_p9)  ;;  %s1258_s23 = smov (!%p390_p9), 112  }
  0x15   : > { %s1602_s2 = sld [smem:[#allocation7_spill]] (!%p390_p9)  ;;  %s1260_s30 = smov (!%p390_p9), 96  }
  0x16   : > { %s1261_s15 = smov (!%p390_p9), 64   ;;  %s1262_s16 = smov (!%p390_p9), 80  }
  0x17   : > { %s1265_s22 = smov (!%p390_p9), 56  }
  0x18   : > { %s433_s20 = scalar_select %p432_p10, %s1360_s29, 1  ;;  %vm439_vm0 = vcmask 261120   ;;  %v1257_v2 = vmov 32.0   ;;  %v1161_v33 = vld [vmem:[%s1583_s4] ss:$0 sm:$0xff]  ;;  %vm511_vm5 = vcmask 64512  }
  0x19   : > { %1167 = vrcp.f32 %v1257_v2  ;;  %v480_v14 = vld [vmem:[%s1600_s3 + $0x18] sm:$0xff]  ;;  %v479_v15 = vld [vmem:[%s1600_s3 + $0x10] sm:$0xff]  ;;  %v478_v16 = vld [vmem:[%s1600_s3 + $0x8] sm:$0xff] }
  0x1a   : > { %s1081_s21 = sshll.u32 %s433_s20, 3  ;;  %500 = vmatpush.msra.mxu0 %v480_v14  ;;  %v477_v17 = vld [vmem:[%s1600_s3] sm:$0xff]  ;;  %s1263_s20 = smov 88  }
  0x1b   : > { %s435_s24 = scalar_lea.vmem %s1599_s0, %s1081_s21  ;;  %v1159_v27 = vld [vmem:[%s1601_s1] ss:$0 sm:$0xff]  ;;  %s1264_s21 = smov 48  }
  0x1c   : > { %v1392_v0 = vld [vmem:[%s435_s24] sm:$0xff]  ;;  %501 = vmatpush.msra.mxu0 %v479_v15  ;;  %s1259_s24 = smov 120   ;;  %v1089_v15 = vld [vmem:[%s1584_s5 + $0x8] sm:$0xff] }
  0x1d   : > { %v440_v1 = vsel %vm439_vm0, %v1392_v0, 0.0  ;;  %v1160_v30 = vld [vmem:[%s1602_s2] ss:$0 sm:$0xff] }
  0x1e   : > { %441 = vadd.xlane.f32.xlu0 %v440_v1  ;;  %502 = vmatpush.msra.mxu0 %v478_v16  ;;  %v1095_v16 = vld [vmem:[%s1584_s5 + $0x10] sm:$0xff] }
  0x1f   : > { %v1168_v3 = vpop.eup %1167 }
  0x20   : > { %v444_v4 = vmul.f32 32.0, %v1168_v3  ;;  %vm448_vm1 = vweird.f32 %v1168_v3  ;;  %503 = vmatpush.msra.mxu0 %v477_v17 }
  0x22   : > { %v445_v5 = vsub.f32 1.0, %v444_v4 }
  0x24   : > { %v446_v6 = vmul.f32 %v1168_v3, %v445_v5 }
  0x26   : > { %v447_v7 = vadd.f32 %v1168_v3, %v446_v6 }
  0x28   : > { %v1396_v8 = vsel %vm448_vm1, %v1168_v3, %v447_v7  ;;  %v573_v3 = vld [vmem:[%s1584_s5] sm:$0xff] }
  0x29   : > { %682 = vmatpush.msra.mxu3 %v573_v3  ;;  %v974_v3 = vld [vmem:[%s1590_s11 + $0x78] sm:$0xff] }
  0x2b   : > { %979 = vmatpush.msrb.mxu3 %v974_v3 }
  0x91   : > { %v442_v9 = vpop.xlane.xlu0 %441 }
  0x92   : > { %v450_v10 = vmul.f32 %v1396_v8, %v442_v9 }
  0x94   : > { %v451_v11 = vsub.f32 %v1392_v0, %v450_v10 }
  0x96   : > { %v452_v12 = vmul.f32 %v451_v11, %v451_v11 }
  0x98   : > { %v453_v13 = vsel %vm439_vm0, %v452_v12, 0.0 }
  0x99   : > { %454 = vadd.xlane.f32.xlu0 %v453_v13 }
 0x10c   : > { %v455_v18 = vpop.xlane.xlu0 %454 }
 0x10d   : > { %v456_v19 = vmul.f32 %v455_v18, %v1396_v8 }
 0x10f   : > { %v457_v20 = vadd.f32 1e-05, %v456_v19 }
 0x111   : > { %1169 = vrsqrt.f32 %v457_v20  ;;  %vm464_vm3 = vweird.f32 %v457_v20 }
 0x117   : > { %v1170_v21 = vpop.eup %1169 }
 0x118   : > { %v459_v22 = vmul.f32 %v1170_v21, %v457_v20  ;;  %vm465_vm2 = vweird.f32 %v1170_v21 }
 0x119   : > { %vm466_vm4 = vmor %vm464_vm3, %vm465_vm2 }
 0x11a   : > { %v460_v23 = vmul.f32 %v1170_v21, %v459_v22 }
 0x11c   : > { %v461_v24 = vmul.f32 0.5, %v460_v23 }
 0x11e   : > { %v462_v25 = vsub.f32 1.5, %v461_v24 }
 0x120   : > { %v463_v26 = vmul.f32 %v1170_v21, %v462_v25 }
 0x122   : > { %v467_v28 = vsel %vm466_vm4, %v1170_v21, %v463_v26 }
 0x123   : > { %v468_v29 = vmul.f32 %v467_v28, %v451_v11  ;;  %v1100_v28 = vld [vmem:[%s1584_s5 + $0x18] sm:$0xff] }
 0x125   : > { %v472_v31 = vmul.f32 %v1159_v27, %v468_v29 }
 0x127   : > { %v476_v32 = vadd.f32 %v1160_v30, %v472_v31 }
 0x129   : > { %1082 = vmatmul.msk.f32.vlgmr.msra.gmra.mxu0 %vm439_vm0, %v476_v32 }
 0x1a6   : > { %v505_v34 = vpop.f32.mrf.mxu0 }
 0x1a7   : > { %v506_v35 = vadd.f32 %v1161_v33, %v505_v34 }
 0x1a9   : > { %687 = vrot.lane.b32.xlu0 %v506_v35, %s1258_s23  ;;  %574 = vrot.lane.b32.xlu2 %v506_v35, %s1259_s24  ;;  %s1266_s23 = smov 104   ;;  %s1267_s24 = smov 72  }
 0x1aa   : > { %509 = vrot.lane.b32.xlu1 %v506_v35, %s1260_s30  ;;  %s1268_s30 = smov 40  }
 0x1b1   : > { %545 = vrot.lane.b32.xlu0 %v506_v35, %s1261_s15  ;;  %689 = vrot.lane.b32.xlu2 %v506_v35, %s1262_s16 }
 0x1b2   : > { %576 = vrot.lane.b32.xlu1 %v506_v35, %s1263_s20  ;;  %s429_s20 = sand.u32 1, %s1247_s26  }
 0x203   : > { %v575_v36 = vpop.permute.xlu2 %574 }
 0x20b   : > { %v690_v41 = vpop.permute.xlu2 %689 }
 0x21b   : > { %v688_v37 = vpop.permute.xlu0 %687 }
 0x21c   : > { %v510_v38 = vpop.permute.xlu1 %509 }
 0x21d   : > { %1083 = vmatpush.xpose.msk.msra.mxu1 %vm511_vm5, %v510_v38  ;;  %v1162_v38 = vld [vmem:[%s1585_s6] ss:$0 sm:$0xff] }
 0x220   : > { %1084 = vmatmul.msk.f32.vlgmr.msra.gmra.mxu1 %vm511_vm5, %v506_v35 }
 0x221   : > { %659 = vmatpush.msrb.mxu1 %v1089_v15  ;;  %v963_v15 = vld [vmem:[%s1590_s11 + $0x20] sm:$0xff] }
 0x223   : > { %v546_v39 = vpop.permute.xlu0 %545  ;;  %772 = vmatpush.msra.mxu1 %v1095_v16  ;;  %v962_v16 = vld [vmem:[%s1590_s11 + $0x18] sm:$0xff] }
 0x224   : > { %v577_v40 = vpop.permute.xlu1 %576  ;;  %566 = vmatpush.msra.mxu2 %v546_v39 }
 0x225   : > { %1086 = vmatpush.xpose.msk.msrb.mxu0 %vm511_vm5, %v577_v40 }
 0x228   : > { %1087 = vmatmul.msk.f32.vlgmr.msrb.gmra.mxu0 %vm511_vm5, %v575_v36 }
 0x229   : > { %1092 = vmatpush.xpose.msk.msra.mxu0 %vm511_vm5, %v690_v41 }
 0x230   : > { %1093 = vmatmul.msk.f32.vlgmr.msra.gmra.mxu0 %vm511_vm5, %v688_v37 }
 0x29d   : > { %v533_v42 = vpop.f32.mrf.mxu1 }
 0x29e   : > { %v536_v43 = vsel %vm511_vm5, %v533_v42, -inf }
 0x29f   : > { %537 = vmax.xlane.f32.xlu1 %v536_v43 }
 0x2a5   : > { %v599_v44 = vpop.f32.mrf.mxu0 }
 0x2a6   : > { %v602_v45 = vsel %vm511_vm5, %v599_v44, -inf }
 0x2a7   : > { %603 = vmax.xlane.f32.xlu2 %v602_v45 }
 0x2ad   : > { %v712_v46 = vpop.f32.mrf.mxu0 }
 0x2ae   : > { %v715_v47 = vsel %vm511_vm5, %v712_v46, -inf }
 0x2af   : > { %716 = vmax.xlane.f32.xlu0 %v715_v47 }
 0x2b8   : > { %724 = vrot.lane.b32.xlu1 %v506_v35, %s1264_s21  ;;  %s1080_s21 = sshll.u32 %s429_s20, 3 }
 0x2b9   : > { %s431_s15 = scalar_lea.vmem [#allocation2], %s1080_s21  ;;  %s1213_s21 = scalar_lea.hbm %s1592_s13, 16 }
 0x2ba   : > { %s1014_s16 = sshll.u32 %s431_s15, 4  ;;  %s1015_s16 = int_to_ptr.vmem [resolvable:$true] %s1014_s16 }
 0x2bf   : > { %611 = vrot.lane.b32.xlu2 %v506_v35, %s1265_s22  ;;  %s1105_s22 = sshll.u32 %s1360_s29, 3  ;;  %s1002_s29 = scalar_lea.sflag [#allocation3], %s429_s20 }
 0x2c0   : > { %778 = vrot.lane.b32.xlu1 %v506_v35, %s1266_s23 }
 0x2c7   : > { %780 = vrot.lane.b32.xlu2 %v506_v35, %s1267_s24 }
 0x2cf   : > { %815 = vrot.lane.b32.xlu2 %v506_v35, %s1268_s30  ;;  %s1012_s30 = scalar_lea.hbm %s1592_s13, %s1105_s22 }
 0x2d0   : > { %s1016_s2 = sshll.u32 %s1012_s30, 4  ;;  %s1017_s2 = int_to_ptr.hbm [resolvable:$true] %s1016_s2 }
 0x2d1   : > { %s1207_s3 = sshra.s32 %s1017_s2, 4  ;;  %s1208_s3 = int_to_ptr.hbm [resolvable:$true] %s1207_s3 }
 0x2d2   : > { %s1209_s23 = scalar_lea.hbm %s1208_s3, 8  ;;  %p1214_p0 = scmp.lt.s32.totalorder %s1208_s3, %s1592_s13 }
 0x2d3   : > { %p1210_p11 = scmp.ne.s32.totalorder %s1208_s3, %s1209_s23  ;;  %p1215_p1 = scmp.lt.s32.totalorder %s1213_s21, %s1209_s23 }
 0x2d5   : > { %p1211_p12 = pnand %p1210_p11, %p1377_p5  ;;  %p1216_p2 = por %p1215_p1, %p1214_p0 }
 0x2d7   : > { %p1212_p13 = pneg %p1211_p12 }
 0x2d9   : > { %p1217_p3 = pnand %p1216_p2, %p1212_p13 }
 0x312   : > { %v538_v48 = vpop.xlane.xlu1 %537 }
 0x313   : > { %v539_v49 = vsub.f32 %v533_v42, %v538_v48 }
 0x315   : > { %v540_v50 = vmul.f32 1.442695, %v539_v49  ;;  %v910_v49 = vld [vmem:[%s1588_s9 + $0x18] sm:$0xff] }
 0x317   : > { %1171 = vpow2.f32 %v540_v50  ;;  %v908_v50 = vld [vmem:[%s1588_s9 + $0x8] sm:$0xff] }
 0x31a   : > { %v604_v51 = vpop.xlane.xlu2 %603 }
 0x31b   : > { %v605_v52 = vsub.f32 %v599_v44, %v604_v51  ;;  %v907_v51 = vld [vmem:[%s1588_s9] sm:$0xff] }
 0x31d   : > { %v1172_v53 = vpop.eup %1171  ;;  %v606_v54 = vmul.f32 1.442695, %v605_v52 }
 0x31e   : > { %1085 = vmatmul.msk.f32.vlgmr.msra.gmra.mxu2 %vm511_vm5, %v1172_v53  ;;  %v542_v55 = vsel %vm511_vm5, %v1172_v53, 0.0 }
 0x31f   : > { %1173 = vpow2.f32 %v606_v54  ;;  %543 = vadd.xlane.f32.xlu1 %v542_v55 }
 0x322   : > { %v717_v56 = vpop.xlane.xlu0 %716  ;;  %v612_v57 = vpop.permute.xlu2 %611 }
 0x323   : > { %v718_v58 = vsub.f32 %v712_v46, %v717_v56  ;;  %632 = vmatpush.msrb.mxu2 %v612_v57 }
 0x325   : > { %v1174_v59 = vpop.eup %1173  ;;  %v719_v60 = vmul.f32 1.442695, %v718_v58 }
 0x326   : > { %1088 = vmatmul.msk.f32.vlgmr.msrb.gmra.mxu2 %vm511_vm5, %v1174_v59  ;;  %v608_v13 = vsel %vm511_vm5, %v1174_v59, 0.0 }
 0x327   : > { %1175 = vpow2.f32 %v719_v60 }
 0x32a   : > { %v781_v61 = vpop.permute.xlu2 %780  ;;  %v725_v62 = vpop.permute.xlu1 %724 }
 0x32b   : > { %745 = vmatpush.msra.mxu2 %v725_v62 }
 0x32d   : > { %1097 = vmatpush.xpose.msk.msrb.mxu2 %vm511_vm5, %v781_v61  ;;  %v1176_v63 = vpop.eup %1175  ;;  %v1163_v61 = vld [vmem:[%s1586_s7] ss:$0 sm:$0xff] }
 0x32e   : > { %1094 = vmatmul.msk.f32.vlgmr.msra.gmra.mxu2 %vm511_vm5, %v1176_v63  ;;  %v721_v14 = vsel %vm511_vm5, %v1176_v63, 0.0 }
 0x331   : > { %863 = vmatpush.msra.mxu2 %v1100_v28 }
 0x332   : > { %v816_v1 = vpop.permute.xlu2 %815  ;;  %v779_v2 = vpop.permute.xlu1 %778 }
 0x333   : > { %836 = vmatpush.msrb.mxu0 %v816_v1 }
 0x336   : > { %1098 = vmatmul.msk.f32.vlgmr.msrb.gmra.mxu2 %vm511_vm5, %v779_v2 }
 0x392   : > { %v544_v4 = vpop.xlane.xlu1 %543 }
 0x393   : > { %1177 = vrcp.f32 %v544_v4  ;;  %v973_v4 = vld [vmem:[%s1590_s11 + $0x70] sm:$0xff] }
 0x394   : > { %980 = vmatpush.msrb.mxu3 %v973_v4 }
 0x399   : > { %v1178_v5 = vpop.eup %1177 }
 0x3a1   : > { %v568_v6 = vpop.f32.mrf.mxu2 }
 0x3a2   : > { %v572_v7 = vmul.f32 %v1178_v5, %v568_v6  ;;  %v972_v5 = vld [vmem:[%s1590_s11 + $0x68] sm:$0xff]  ;;  %v971_v6 = vld [vmem:[%s1590_s11 + $0x60] sm:$0xff] }
 0x3a3   : > { %981 = vmatpush.msrb.mxu3 %v972_v5 }
 0x3a4   : > { %1091 = vmatmul.msk.f32.vlgmr.msra.gmra.mxu3 %vm511_vm5, %v572_v7  ;;  %v970_v7 = vld [vmem:[%s1590_s11 + $0x58] sm:$0xff] }
 0x3a5   : > { %982 = vmatpush.msrb.mxu3 %v971_v6 }
 0x3a7   : > { %983 = vmatpush.msrb.mxu3 %v970_v7 }
 0x3a9   : > { %v634_v9 = vpop.f32.mrf.mxu2 }
 0x3b1   : > { %v747_v10 = vpop.f32.mrf.mxu2 }
 0x3b9   : > { %v803_v11 = vpop.f32.mrf.mxu2 }
 0x3ba   : > { %v806_v12 = vsel %vm511_vm5, %v803_v11, -inf }
 0x3bb   : > { %807 = vmax.xlane.f32.xlu0 %v806_v12  ;;  %v966_v12 = vld [vmem:[%s1590_s11 + $0x38] sm:$0xff] }
 0x3c3   : > { %609 = vadd.xlane.f32.xlu0 %v608_v13  ;;  %v965_v13 = vld [vmem:[%s1590_s11 + $0x30] sm:$0xff] }
 0x3cb   : > { %722 = vadd.xlane.f32.xlu0 %v721_v14  ;;  %v964_v14 = vld [vmem:[%s1590_s11 + $0x28] sm:$0xff] }
 0x427   : > { %v684_v34 = vpop.f32.mrf.mxu3 }
 0x42e   : > { %v808_v17 = vpop.xlane.xlu0 %807 }
 0x42f   : > { %v809_v18 = vsub.f32 %v803_v11, %v808_v17  ;;  %v967_v11 = vld [vmem:[%s1590_s11 + $0x40] sm:$0xff] }
 0x430   : > { %v1165_v17 = vld [vmem:[%s1589_s10] ss:$0 sm:$0xff] }
 0x431   : > { %v810_v19 = vmul.f32 1.442695, %v809_v18  ;;  %v961_v18 = vld [vmem:[%s1590_s11 + $0x10] sm:$0xff] }
 0x433   : > { %1179 = vpow2.f32 %v810_v19  ;;  %v960_v19 = vld [vmem:[%s1590_s11 + $0x8] sm:$0xff] }
 0x436   : > { %v610_v20 = vpop.xlane.xlu0 %609 }
 0x437   : > { %1181 = vrcp.f32 %v610_v20 }
 0x439   : > { %v1180_v21 = vpop.eup %1179 }
 0x43a   : > { %1099 = vmatmul.msk.f32.vlgmr.msrb.gmra.mxu0 %vm511_vm5, %v1180_v21  ;;  %v812_v22 = vsel %vm511_vm5, %v1180_v21, 0.0 }
 0x43b   : > { %813 = vadd.xlane.f32.xlu2 %v812_v22  ;;  %v959_v22 = vld [vmem:[%s1590_s11] sm:$0xff] }
 0x43d   : > { %v1182_v23 = vpop.eup %1181 }
 0x43e   : > { %v723_v24 = vpop.xlane.xlu0 %722  ;;  %v638_v25 = vmul.f32 %v1182_v23, %v634_v9  ;;  %v969_v9 = vld [vmem:[%s1590_s11 + $0x50] sm:$0xff] }
 0x43f   : > { %1183 = vrcp.f32 %v723_v24  ;;  %984 = vmatpush.msrb.mxu3 %v969_v9 }
 0x440   : > { %1090 = vmatmul.msk.f32.vlgmr.msrb.gmra.mxu1 %vm511_vm5, %v638_v25 }
 0x441   : > { %930 = vmatpush.msrb.mxu1 %v910_v49 }
 0x445   : > { %v1184_v26 = vpop.eup %1183 }
 0x446   : > { %v751_v27 = vmul.f32 %v1184_v26, %v747_v10  ;;  %v968_v10 = vld [vmem:[%s1590_s11 + $0x48] sm:$0xff] }
 0x447   : > { %985 = vmatpush.msrb.mxu3 %v968_v10 }
 0x448   : > { %1096 = vmatmul.msk.f32.vlgmr.msra.gmra.mxu1 %vm511_vm5, %v751_v27 }
 0x449   : > { %986 = vmatpush.msrb.mxu3 %v967_v11 }
 0x44b   : > { %987 = vmatpush.msrb.mxu3 %v966_v12 }
 0x44d   : > { %988 = vmatpush.msrb.mxu3 %v965_v13 }
 0x44f   : > { %989 = vmatpush.msrb.mxu3 %v964_v14 }
 0x451   : > { %990 = vmatpush.msrb.mxu3 %v963_v15 }
 0x453   : > { %991 = vmatpush.msrb.mxu3 %v962_v16 }
 0x455   : > { %992 = vmatpush.msrb.mxu3 %v961_v18 }
 0x457   : > { %993 = vmatpush.msrb.mxu3 %v960_v19 }
 0x459   : > { %994 = vmatpush.msrb.mxu3 %v959_v22 }
 0x4ae   : > { %v814_v29 = vpop.xlane.xlu2 %813 }
 0x4af   : > { %1185 = vrcp.f32 %v814_v29 }
 0x4b5   : > { %v1186_v30 = vpop.eup %1185 }
 0x4b7   : > { %v838_v31 = vpop.f32.mrf.mxu0 }
 0x4b8   : > { %v842_v32 = vmul.f32 %v1186_v30, %v838_v31 }
 0x4ba   : > { %1101 = vmatmul.msk.f32.vlgmr.msra.gmra.mxu2 %vm511_vm5, %v842_v32 }
 0x4bd   : > { %v661_v33 = vpop.f32.mrf.mxu1 }
 0x4be   : > { %v685_v36 = vadd.f32 %v684_v34, %v661_v33 }
 0x4c5   : > { %v774_v35 = vpop.f32.mrf.mxu1 }
 0x4c6   : > { %v777_v37 = vadd.f32 %v774_v35, %v685_v36 }
 0x53d   : > { %v865_v39 = vpop.f32.mrf.mxu2 }
 0x53e   : > { %v868_v40 = vadd.f32 %v865_v39, %v777_v37 }
 0x540   : > { %v873_v41 = vadd.f32 %v1162_v38, %v868_v40  ;;  %v1166_v38 = vld [vmem:[%s1591_s12] ss:$0 sm:$0xff] }
 0x542   : > { %v1464_v42 = vadd.f32 %v873_v41, %v1392_v0  ;;  %v909_v0 = vld [vmem:[%s1588_s9 + $0x10] sm:$0xff] }
 0x543   : > { %931 = vmatpush.msrb.mxu1 %v909_v0 }
 0x544   : > { %v877_v43 = vsel %vm439_vm0, %v1464_v42, 0.0 }
 0x545   : > { %878 = vadd.xlane.f32.xlu0 %v877_v43  ;;  %932 = vmatpush.msrb.mxu1 %v908_v50 }
 0x547   : > { %933 = vmatpush.msrb.mxu1 %v907_v51 }
 0x5b8   : > { %v879_v44 = vpop.xlane.xlu0 %878 }
 0x5b9   : > { %v880_v45 = vmul.f32 %v879_v44, %v1396_v8 }
 0x5bb   : > { %v881_v46 = vsub.f32 %v1464_v42, %v880_v45 }
 0x5bd   : > { %v882_v47 = vmul.f32 %v881_v46, %v881_v46 }
 0x5bf   : > { %v883_v48 = vsel %vm439_vm0, %v882_v47, 0.0 }
 0x5c0   : > { %884 = vadd.xlane.f32.xlu0 %v883_v48 }
 0x633   : > { %v885_v52 = vpop.xlane.xlu0 %884 }
 0x634   : > { %v886_v53 = vmul.f32 %v885_v52, %v1396_v8  ;;  %v1164_v8 = vld [vmem:[%s1587_s8] ss:$0 sm:$0xff] }
 0x636   : > { %v887_v54 = vadd.f32 1e-05, %v886_v53 }
 0x638   : > { %1187 = vrsqrt.f32 %v887_v54  ;;  %vm894_vm7 = vweird.f32 %v887_v54 }
 0x63e   : > { %v1188_v55 = vpop.eup %1187 }
 0x63f   : > { %v889_v56 = vmul.f32 %v1188_v55, %v887_v54  ;;  %vm895_vm6 = vweird.f32 %v1188_v55 }
 0x640   : > { %vm896_vm8 = vmor %vm894_vm7, %vm895_vm6 }
 0x641   : > { %v890_v57 = vmul.f32 %v1188_v55, %v889_v56 }
 0x643   : > { %v891_v58 = vmul.f32 0.5, %v890_v57 }
 0x645   : > { %v892_v59 = vsub.f32 1.5, %v891_v58 }
 0x647   : > { %v893_v60 = vmul.f32 %v1188_v55, %v892_v59 }
 0x649   : > { %v897_v62 = vsel %vm896_vm8, %v1188_v55, %v893_v60 }
 0x64a   : > { %v898_v63 = vmul.f32 %v897_v62, %v881_v46 }
 0x64c   : > { %v902_v1 = vmul.f32 %v1163_v61, %v898_v63 }
 0x64e   : > { %v906_v2 = vadd.f32 %v1164_v8, %v902_v1 }
 0x650   : > { %1102 = vmatmul.msk.f32.vlgmr.msrb.gmra.mxu1 %vm439_vm0, %v906_v2 }
 0x6cd   : > { %v935_v20 = vpop.f32.mrf.mxu1 }
 0x6ce   : > { %v936_v21 = vadd.f32 %v1165_v17, %v935_v20 }
 0x6d0   : > { %v1103_v23 = vmul.f32 -1.702, %v936_v21 }
 0x6d2   : > { %v940_v24 = vmul.f32 1.442695, %v1103_v23 }
 0x6d4   : > { %1189 = vpow2.f32 %v940_v24 }
 0x6da   : > { %v1190_v25 = vpop.eup %1189 }
 0x6db   : > { %v942_v26 = vadd.f32 1.0, %v1190_v25 }
 0x6dd   : > { %1191 = vrcp.f32 %v942_v26  ;;  %v954_v30 = vand.u32 2147483648, %v942_v26  ;;  %v952_v32 = vand.u32 2147483647, %v942_v26  ;;  %vm948_vm10 = vweird.f32 %v942_v26 }
 0x6df   : > { %v955_v34 = vor.u32 1.1754944e-38, %v954_v30  ;;  %vm953_vm12 = vcmp.eq.f32.partialorder %v952_v32, 8.507059e+37 }
 0x6e3   : > { %v1192_v27 = vpop.eup %1191 }
 0x6e4   : > { %v944_v28 = vmul.f32 %v1192_v27, %v942_v26  ;;  %vm949_vm9 = vweird.f32 %v1192_v27 }
 0x6e5   : > { %vm950_vm11 = vmor %vm948_vm10, %vm949_vm9 }
 0x6e6   : > { %v945_v29 = vsub.f32 1.0, %v944_v28 }
 0x6e8   : > { %v946_v31 = vmul.f32 %v1192_v27, %v945_v29 }
 0x6ea   : > { %v947_v33 = vadd.f32 %v1192_v27, %v946_v31 }
 0x6ec   : > { %v951_v35 = vsel %vm950_vm11, %v1192_v27, %v947_v33 }
 0x6ed   : > { %v956_v36 = vsel %vm953_vm12, %v955_v34, %v951_v35 }
 0x6ee   : > { %v958_v37 = vmul.f32 %v956_v36, %v936_v21 }
 0x6f0   : > { %995 = vmatmul.f32.vlgmr.msrb.gmra.mxu3 %v958_v37 }
 0x773   : > { %v996_v39 = vpop.f32.mrf.mxu3 }
 0x774   : > { %v997_v40 = vadd.f32 %v1166_v38, %v996_v39 }
 0x776   : > { %v999_v41 = vadd.f32 %v997_v40, %v1464_v42 }
 0x778   : > { %1000 = vst.msk [vmem:[%s431_s15] sm:$0xff] %vm439_vm0, %v999_v41 }
 0x779   : > { %1220 = shalt.err (!%p1217_p3)
}
 0x77a   : > { %1108 = dma.vmem_to_hbm [thread:$0]  (%p1377_p5), %s1015_s16, 128, %s1017_s2, %s1002_s29  }
 0x77b PF: > { %p1114_p4 = scmp.ge.s32.totalorder %s1255_s28, 2  ;;  %s1028_s20 = sand.u32 1, %s1243_s25  }
 0x77c   : > { %s1029_s30 = scalar_lea.sflag [#allocation3], %s1028_s20 }
 0x77d   : > { %p1111_p7 = pnand %p1114_p4, %p1381_p6 }
 0x77f   : > { %p1112_p8 = pneg %p1111_p7 }
 0x781   : > { %1238 = dma.done.wait (%p1112_p8), %s1029_s30, 128  }
 0x782   : > { %1240 = vsyncadd (%p1112_p8), %s1029_s30, 4294967168  ;;  %p23_p9 = scmp.ge.s32.totalorder %s1364_s14, 4   ;;  %s1603_s25 = smov %s1247_s26 }
 0x783   : > { %s1604_s26 = smov %s1251_s27  ;;  %s1605_s27 = smov %s1375_s17 }
 0x784   : > { %s1606_s28 = smov %s1364_s14  ;;  %25 = sbr.rel (!%p23_p9) target bundleno = 8 (0x8), region = 110 }
 0x789   :  { %1035 = vsyncpa [#allocation3], 1 }
 0x78a   :  { %1037 = vsyncpa [#allocation3 + $0x1], 1 }

// kernel: tpu_custom_call.1
= control target key start
LH: loop header
LB: loop body
LE: loop exit
PB: predicated region body
PF: predicated region fallthrough
CT: control target
= control target key end

     0   :  { %s1579_s0 = inlined_call_operand.vmem [shape: f32[2,8,32], index: 0, kind: input, shape index: {}]   ;;  %s1580_s1 = inlined_call_operand.vmem [shape: f32[1,32], index: 1, kind: input, shape index: {}]   ;;  %s1581_s2 = inlined_call_operand.vmem [shape: f32[1,32], index: 2, kind: input, shape index: {}]   ;;  %s1582_s3 = inlined_call_operand.vmem [shape: f32[32,96], index: 3, kind: input, shape index: {}]   ;;  %s1583_s4 = inlined_call_operand.vmem [shape: f32[1,96], index: 4, kind: input, shape index: {}]   ;;  %s1584_s5 = inlined_call_operand.vmem [shape: f32[4,8,32], index: 5, kind: input, shape index: {}]   ;;  %s1585_s6 = inlined_call_operand.vmem [shape: f32[1,32], index: 6, kind: input, shape index: {}]   ;;  %s1586_s7 = inlined_call_operand.vmem [shape: f32[1,32], index: 7, kind: input, shape index: {}]   ;;  %s1587_s8 = inlined_call_operand.vmem [shape: f32[1,32], index: 8, kind: input, shape index: {}]   ;;  %s1588_s9 = inlined_call_operand.vmem [shape: f32[32,128], index: 9, kind: input, shape index: {}]   ;;  %s1589_s10 = inlined_call_operand.vmem [shape: f32[1,128], index: 10, kind: input, shape index: {}]   ;;  %s1590_s11 = inlined_call_operand.vmem [shape: f32[128,32], index: 11, kind: input, shape index: {}]   ;;  %s1591_s12 = inlined_call_operand.vmem [shape: f32[1,32], index: 12, kind: input, shape index: {}]   ;;  %s1592_s13 = inlined_call_operand.hbm [shape: f32[2,8,32], index: 13, kind: output, shape index: {}]  }
   0x1   :  { %1593 = sst [smem:[#allocation5_spill]] %s1579_s0 }
   0x2   :  { %1594 = sst [smem:[#allocation6_spill]] %s1580_s1 }
   0x3   :  { %1595 = sst [smem:[#allocation7_spill]] %s1581_s2 }
   0x4   :  { %1596 = sst [smem:[#allocation8_spill]] %s1582_s3 }
   0x5   :  { %18 = vsyncpa [#allocation3], 0 }
   0x6   :  { %20 = vsyncpa [#allocation3 + $0x1], 0  ;;  %s1339_s25 = smov 0   ;;  %s1341_s26 = smov 0  }
   0x7   :  { %s1343_s27 = smov 0   ;;  %s1345_s28 = smov 0  }
   0x8 LB: > { %s1360_s29 = sadd.s32 4294967295, %s1255_s28   ;;  %s1076_s30 = sadd.s32 4294967294, %s1255_s28   ;;  %s1255_s28 = sphi %s1345_s28, %s1606_s28   ;;  %s1251_s27 = sphi %s1343_s27, %s1605_s27   ;;  %s1247_s26 = sphi %s1341_s26, %s1604_s26   ;;  %s1243_s25 = sphi %s1339_s25, %s1603_s25  }
   0x9   : > { %s1364_s14 = sadd.s32 1, %s1255_s28   ;;  %s311_s15 = sadd.s32 1, %s1251_s27 }
   0xa   : > { %s308_s16 = ssub.s32 %s1255_s28, %s1364_s14  ;;  %p321_p0 = scmp.ne.s32.totalorder %s1251_s27, %s1247_s26 }
   0xb   : > { %p309_p1 = scmp.eq.s32.totalorder %s308_s16, 0  ;;  %p322_p2 = scmp.eq.s32.totalorder %s1360_s29, 1 }
   0xc   : > { %p327_p3 = scmp.ne.s32.totalorder %s1247_s26, %s1243_s25  ;;  %p328_p4 = scmp.eq.s32.totalorder %s1076_s30, 1 }
   0xd   : > { %s1375_s17 = scalar_select %p309_p1, %s1251_s27, %s311_s15  }
   0xe   : > { %p1377_p5 = por %p322_p2, %p321_p0  ;;  %p1381_p6 = por %p328_p4, %p327_p3 }
   0xf   : > { %p1079_p7 = scmp.ge.s32.totalorder %s1255_s28, 1  ;;  %p389_p8 = scmp.lt.s32.totalorder %s1255_s28, 3 }
  0x11   : > { %p390_p9 = pnand %p1079_p7, %p389_p8 }
  0x12   : > { %p432_p10 = scmp.lt.s32.totalorder (!%p390_p9), %s1360_s29, 1  ;;  %s1599_s0 = sld [smem:[#allocation5_spill]] (!%p390_p9) }
  0x13   : > { %393 = sbr.rel (%p390_p9) target bundleno = 1915 (0x77b), region = 72  ;;  %s1600_s3 = sld [smem:[#allocation8_spill]] (!%p390_p9) }
  0x14   : > { %s1601_s1 = sld [smem:[#allocation6_spill]] (!%p390_p9)  ;;  %s1258_s23 = smov (!%p390_p9), 112  }
  0x15   : > { %s1602_s2 = sld [smem:[#allocation7_spill]] (!%p390_p9)  ;;  %s1260_s30 = smov (!%p390_p9), 96  }
  0x16   : > { %s1261_s15 = smov (!%p390_p9), 64   ;;  %s1262_s16 = smov (!%p390_p9), 80  }
  0x17   : > { %s1265_s22 = smov (!%p390_p9), 56  }
  0x18   : > { %s433_s20 = scalar_select %p432_p10, %s1360_s29, 1  ;;  %vm439_vm0 = vcmask 261120   ;;  %v1257_v2 = vmov 32.0   ;;  %v1161_v33 = vld [vmem:[%s1583_s4] ss:$0 sm:$0xff]  ;;  %vm511_vm5 = vcmask 64512  }
  0x19   : > { %1167 = vrcp.f32 %v1257_v2  ;;  %v480_v14 = vld [vmem:[%s1600_s3 + $0x18] sm:$0xff]  ;;  %v479_v15 = vld [vmem:[%s1600_s3 + $0x10] sm:$0xff]  ;;  %v478_v16 = vld [vmem:[%s1600_s3 + $0x8] sm:$0xff] }
  0x1a   : > { %s1081_s21 = sshll.u32 %s433_s20, 3  ;;  %500 = vmatpush.msra.mxu0 %v480_v14  ;;  %v477_v17 = vld [vmem:[%s1600_s3] sm:$0xff]  ;;  %s1263_s20 = smov 88  }
  0x1b   : > { %s435_s24 = scalar_lea.vmem %s1599_s0, %s1081_s21  ;;  %v1159_v27 = vld [vmem:[%s1601_s1] ss:$0 sm:$0xff]  ;;  %s1264_s21 = smov 48  }
  0x1c   : > { %v1392_v0 = vld [vmem:[%s435_s24] sm:$0xff]  ;;  %501 = vmatpush.msra.mxu0 %v479_v15  ;;  %s1259_s24 = smov 120   ;;  %v1089_v15 = vld [vmem:[%s1584_s5 + $0x8] sm:$0xff] }
  0x1d   : > { %v440_v1 = vsel %vm439_vm0, %v1392_v0, 0.0  ;;  %v1160_v30 = vld [vmem:[%s1602_s2] ss:$0 sm:$0xff] }
  0x1e   : > { %441 = vadd.xlane.f32.xlu0 %v440_v1  ;;  %502 = vmatpush.msra.mxu0 %v478_v16  ;;  %v1095_v16 = vld [vmem:[%s1584_s5 + $0x10] sm:$0xff] }
  0x1f   : > { %v1168_v3 = vpop.eup %1167 }
  0x20   : > { %v444_v4 = vmul.f32 32.0, %v1168_v3  ;;  %vm448_vm1 = vweird.f32 %v1168_v3  ;;  %503 = vmatpush.msra.mxu0 %v477_v17 }
  0x22   : > { %v445_v5 = vsub.f32 1.0, %v444_v4 }
  0x24   : > { %v446_v6 = vmul.f32 %v1168_v3, %v445_v5 }
  0x26   : > { %v447_v7 = vadd.f32 %v1168_v3, %v446_v6 }
  0x28   : > { %v1396_v8 = vsel %vm448_vm1, %v1168_v3, %v447_v7  ;;  %v573_v3 = vld [vmem:[%s1584_s5] sm:$0xff] }
  0x29   : > { %682 = vmatpush.msra.mxu3 %v573_v3  ;;  %v974_v3 = vld [vmem:[%s1590_s11 + $0x78] sm:$0xff] }
  0x2b   : > { %979 = vmatpush.msrb.mxu3 %v974_v3 }
  0x91   : > { %v442_v9 = vpop.xlane.xlu0 %441 }
  0x92   : > { %v450_v10 = vmul.f32 %v1396_v8, %v442_v9 }
  0x94   : > { %v451_v11 = vsub.f32 %v1392_v0, %v450_v10 }
  0x96   : > { %v452_v12 = vmul.f32 %v451_v11, %v451_v11 }
  0x98   : > { %v453_v13 = vsel %vm439_vm0, %v452_v12, 0.0 }
  0x99   : > { %454 = vadd.xlane.f32.xlu0 %v453_v13 }
 0x10c   : > { %v455_v18 = vpop.xlane.xlu0 %454 }
 0x10d   : > { %v456_v19 = vmul.f32 %v455_v18, %v1396_v8 }
 0x10f   : > { %v457_v20 = vadd.f32 1e-05, %v456_v19 }
 0x111   : > { %1169 = vrsqrt.f32 %v457_v20  ;;  %vm464_vm3 = vweird.f32 %v457_v20 }
 0x117   : > { %v1170_v21 = vpop.eup %1169 }
 0x118   : > { %v459_v22 = vmul.f32 %v1170_v21, %v457_v20  ;;  %vm465_vm2 = vweird.f32 %v1170_v21 }
 0x119   : > { %vm466_vm4 = vmor %vm464_vm3, %vm465_vm2 }
 0x11a   : > { %v460_v23 = vmul.f32 %v1170_v21, %v459_v22 }
 0x11c   : > { %v461_v24 = vmul.f32 0.5, %v460_v23 }
 0x11e   : > { %v462_v25 = vsub.f32 1.5, %v461_v24 }
 0x120   : > { %v463_v26 = vmul.f32 %v1170_v21, %v462_v25 }
 0x122   : > { %v467_v28 = vsel %vm466_vm4, %v1170_v21, %v463_v26 }
 0x123   : > { %v468_v29 = vmul.f32 %v467_v28, %v451_v11  ;;  %v1100_v28 = vld [vmem:[%s1584_s5 + $0x18] sm:$0xff] }
 0x125   : > { %v472_v31 = vmul.f32 %v1159_v27, %v468_v29 }
 0x127   : > { %v476_v32 = vadd.f32 %v1160_v30, %v472_v31 }
 0x129   : > { %1082 = vmatmul.msk.f32.vlgmr.msra.gmra.mxu0 %vm439_vm0, %v476_v32 }
 0x1a6   : > { %v505_v34 = vpop.f32.mrf.mxu0 }
 0x1a7   : > { %v506_v35 = vadd.f32 %v1161_v33, %v505_v34 }
 0x1a9   : > { %687 = vrot.lane.b32.xlu0 %v506_v35, %s1258_s23  ;;  %574 = vrot.lane.b32.xlu2 %v506_v35, %s1259_s24  ;;  %s1266_s23 = smov 104   ;;  %s1267_s24 = smov 72  }
 0x1aa   : > { %509 = vrot.lane.b32.xlu1 %v506_v35, %s1260_s30  ;;  %s1268_s30 = smov 40  }
 0x1b1   : > { %545 = vrot.lane.b32.xlu0 %v506_v35, %s1261_s15  ;;  %689 = vrot.lane.b32.xlu2 %v506_v35, %s1262_s16 }
 0x1b2   : > { %576 = vrot.lane.b32.xlu1 %v506_v35, %s1263_s20  ;;  %s429_s20 = sand.u32 1, %s1247_s26  }
 0x203   : > { %v575_v36 = vpop.permute.xlu2 %574 }
 0x20b   : > { %v690_v41 = vpop.permute.xlu2 %689 }
 0x21b   : > { %v688_v37 = vpop.permute.xlu0 %687 }
 0x21c   : > { %v510_v38 = vpop.permute.xlu1 %509 }
 0x21d   : > { %1083 = vmatpush.xpose.msk.msra.mxu1 %vm511_vm5, %v510_v38  ;;  %v1162_v38 = vld [vmem:[%s1585_s6] ss:$0 sm:$0xff] }
 0x220   : > { %1084 = vmatmul.msk.f32.vlgmr.msra.gmra.mxu1 %vm511_vm5, %v506_v35 }
 0x221   : > { %659 = vmatpush.msrb.mxu1 %v1089_v15  ;;  %v963_v15 = vld [vmem:[%s1590_s11 + $0x20] sm:$0xff] }
 0x223   : > { %v546_v39 = vpop.permute.xlu0 %545  ;;  %772 = vmatpush.msra.mxu1 %v1095_v16  ;;  %v962_v16 = vld [vmem:[%s1590_s11 + $0x18] sm:$0xff] }
 0x224   : > { %v577_v40 = vpop.permute.xlu1 %576  ;;  %566 = vmatpush.msra.mxu2 %v546_v39 }
 0x225   : > { %1086 = vmatpush.xpose.msk.msrb.mxu0 %vm511_vm5, %v577_v40 }
 0x228   : > { %1087 = vmatmul.msk.f32.vlgmr.msrb.gmra.mxu0 %vm511_vm5, %v575_v36 }
 0x229   : > { %1092 = vmatpush.xpose.msk.msra.mxu0 %vm511_vm5, %v690_v41 }
 0x230   : > { %1093 = vmatmul.msk.f32.vlgmr.msra.gmra.mxu0 %vm511_vm5, %v688_v37 }
 0x29d   : > { %v533_v42 = vpop.f32.mrf.mxu1 }
 0x29e   : > { %v536_v43 = vsel %vm511_vm5, %v533_v42, -inf }
 0x29f   : > { %537 = vmax.xlane.f32.xlu1 %v536_v43 }
 0x2a5   : > { %v599_v44 = vpop.f32.mrf.mxu0 }
 0x2a6   : > { %v602_v45 = vsel %vm511_vm5, %v599_v44, -inf }
 0x2a7   : > { %603 = vmax.xlane.f32.xlu2 %v602_v45 }
 0x2ad   : > { %v712_v46 = vpop.f32.mrf.mxu0 }
 0x2ae   : > { %v715_v47 = vsel %vm511_vm5, %v712_v46, -inf }
 0x2af   : > { %716 = vmax.xlane.f32.xlu0 %v715_v47 }
 0x2b8   : > { %724 = vrot.lane.b32.xlu1 %v506_v35, %s1264_s21  ;;  %s1080_s21 = sshll.u32 %s429_s20, 3 }
 0x2b9   : > { %s431_s15 = scalar_lea.vmem [#allocation2], %s1080_s21  ;;  %s1213_s21 = scalar_lea.hbm %s1592_s13, 16 }
 0x2ba   : > { %s1014_s16 = sshll.u32 %s431_s15, 4  ;;  %s1015_s16 = int_to_ptr.vmem [resolvable:$true] %s1014_s16 }
 0x2bf   : > { %611 = vrot.lane.b32.xlu2 %v506_v35, %s1265_s22  ;;  %s1105_s22 = sshll.u32 %s1360_s29, 3  ;;  %s1002_s29 = scalar_lea.sflag [#allocation3], %s429_s20 }
 0x2c0   : > { %778 = vrot.lane.b32.xlu1 %v506_v35, %s1266_s23 }
 0x2c7   : > { %780 = vrot.lane.b32.xlu2 %v506_v35, %s1267_s24 }
 0x2cf   : > { %815 = vrot.lane.b32.xlu2 %v506_v35, %s1268_s30  ;;  %s1012_s30 = scalar_lea.hbm %s1592_s13, %s1105_s22 }
 0x2d0   : > { %s1016_s2 = sshll.u32 %s1012_s30, 4  ;;  %s1017_s2 = int_to_ptr.hbm [resolvable:$true] %s1016_s2 }
 0x2d1   : > { %s1207_s3 = sshra.s32 %s1017_s2, 4  ;;  %s1208_s3 = int_to_ptr.hbm [resolvable:$true] %s1207_s3 }
 0x2d2   : > { %s1209_s23 = scalar_lea.hbm %s1208_s3, 8  ;;  %p1214_p0 = scmp.lt.s32.totalorder %s1208_s3, %s1592_s13 }
 0x2d3   : > { %p1210_p11 = scmp.ne.s32.totalorder %s1208_s3, %s1209_s23  ;;  %p1215_p1 = scmp.lt.s32.totalorder %s1213_s21, %s1209_s23 }
 0x2d5   : > { %p1211_p12 = pnand %p1210_p11, %p1377_p5  ;;  %p1216_p2 = por %p1215_p1, %p1214_p0 }
 0x2d7   : > { %p1212_p13 = pneg %p1211_p12 }
 0x2d9   : > { %p1217_p3 = pnand %p1216_p2, %p1212_p13 }
 0x312   : > { %v538_v48 = vpop.xlane.xlu1 %537 }
 0x313   : > { %v539_v49 = vsub.f32 %v533_v42, %v538_v48 }
 0x315   : > { %v540_v50 = vmul.f32 1.442695, %v539_v49  ;;  %v910_v49 = vld [vmem:[%s1588_s9 + $0x18] sm:$0xff] }
 0x317   : > { %1171 = vpow2.f32 %v540_v50  ;;  %v908_v50 = vld [vmem:[%s1588_s9 + $0x8] sm:$0xff] }
 0x31a   : > { %v604_v51 = vpop.xlane.xlu2 %603 }
 0x31b   : > { %v605_v52 = vsub.f32 %v599_v44, %v604_v51  ;;  %v907_v51 = vld [vmem:[%s1588_s9] sm:$0xff] }
 0x31d   : > { %v1172_v53 = vpop.eup %1171  ;;  %v606_v54 = vmul.f32 1.442695, %v605_v52 }
 0x31e   : > { %1085 = vmatmul.msk.f32.vlgmr.msra.gmra.mxu2 %vm511_vm5, %v1172_v53  ;;  %v542_v55 = vsel %vm511_vm5, %v1172_v53, 0.0 }
 0x31f   : > { %1173 = vpow2.f32 %v606_v54  ;;  %543 = vadd.xlane.f32.xlu1 %v542_v55 }
 0x322   : > { %v717_v56 = vpop.xlane.xlu0 %716  ;;  %v612_v57 = vpop.permute.xlu2 %611 }
 0x323   : > { %v718_v58 = vsub.f32 %v712_v46, %v717_v56  ;;  %632 = vmatpush.msrb.mxu2 %v612_v57 }
 0x325   : > { %v1174_v59 = vpop.eup %1173  ;;  %v719_v60 = vmul.f32 1.442695, %v718_v58 }
 0x326   : > { %1088 = vmatmul.msk.f32.vlgmr.msrb.gmra.mxu2 %vm511_vm5, %v1174_v59  ;;  %v608_v13 = vsel %vm511_vm5, %v1174_v59, 0.0 }
 0x327   : > { %1175 = vpow2.f32 %v719_v60 }
 0x32a   : > { %v781_v61 = vpop.permute.xlu2 %780  ;;  %v725_v62 = vpop.permute.xlu1 %724 }
 0x32b   : > { %745 = vmatpush.msra.mxu2 %v725_v62 }
 0x32d   : > { %1097 = vmatpush.xpose.msk.msrb.mxu2 %vm511_vm5, %v781_v61  ;;  %v1176_v63 = vpop.eup %1175  ;;  %v1163_v61 = vld [vmem:[%s1586_s7] ss:$0 sm:$0xff] }
 0x32e   : > { %1094 = vmatmul.msk.f32.vlgmr.msra.gmra.mxu2 %vm511_vm5, %v1176_v63  ;;  %v721_v14 = vsel %vm511_vm5, %v1176_v63, 0.0 }
 0x331   : > { %863 = vmatpush.msra.mxu2 %v1100_v28 }
 0x332   : > { %v816_v1 = vpop.permute.xlu2 %815  ;;  %v779_v2 = vpop.permute.xlu1 %778 }
 0x333   : > { %836 = vmatpush.msrb.mxu0 %v816_v1 }
 0x336   : > { %1098 = vmatmul.msk.f32.vlgmr.msrb.gmra.mxu2 %vm511_vm5, %v779_v2 }
 0x392   : > { %v544_v4 = vpop.xlane.xlu1 %543 }
 0x393   : > { %1177 = vrcp.f32 %v544_v4  ;;  %v973_v4 = vld [vmem:[%s1590_s11 + $0x70] sm:$0xff] }
 0x394   : > { %980 = vmatpush.msrb.mxu3 %v973_v4 }
 0x399   : > { %v1178_v5 = vpop.eup %1177 }
 0x3a1   : > { %v568_v6 = vpop.f32.mrf.mxu2 }
 0x3a2   : > { %v572_v7 = vmul.f32 %v1178_v5, %v568_v6  ;;  %v972_v5 = vld [vmem:[%s1590_s11 + $0x68] sm:$0xff]  ;;  %v971_v6 = vld [vmem:[%s1590_s11 + $0x60] sm:$0xff] }
 0x3a3   : > { %981 = vmatpush.msrb.mxu3 %v972_v5 }
 0x3a4   : > { %1091 = vmatmul.msk.f32.vlgmr.msra.gmra.mxu3 %vm511_vm5, %v572_v7  ;;  %v970_v7 = vld [vmem:[%s1590_s11 + $0x58] sm:$0xff] }
 0x3a5   : > { %982 = vmatpush.msrb.mxu3 %v971_v6 }
 0x3a7   : > { %983 = vmatpush.msrb.mxu3 %v970_v7 }
 0x3a9   : > { %v634_v9 = vpop.f32.mrf.mxu2 }
 0x3b1   : > { %v747_v10 = vpop.f32.mrf.mxu2 }
 0x3b9   : > { %v803_v11 = vpop.f32.mrf.mxu2 }
 0x3ba   : > { %v806_v12 = vsel %vm511_vm5, %v803_v11, -inf }
 0x3bb   : > { %807 = vmax.xlane.f32.xlu0 %v806_v12  ;;  %v966_v12 = vld [vmem:[%s1590_s11 + $0x38] sm:$0xff] }
 0x3c3   : > { %609 = vadd.xlane.f32.xlu0 %v608_v13  ;;  %v965_v13 = vld [vmem:[%s1590_s11 + $0x30] sm:$0xff] }
 0x3cb   : > { %722 = vadd.xlane.f32.xlu0 %v721_v14  ;;  %v964_v14 = vld [vmem:[%s1590_s11 + $0x28] sm:$0xff] }
 0x427   : > { %v684_v34 = vpop.f32.mrf.mxu3 }
 0x42e   : > { %v808_v17 = vpop.xlane.xlu0 %807 }
 0x42f   : > { %v809_v18 = vsub.f32 %v803_v11, %v808_v17  ;;  %v967_v11 = vld [vmem:[%s1590_s11 + $0x40] sm:$0xff] }
 0x430   : > { %v1165_v17 = vld [vmem:[%s1589_s10] ss:$0 sm:$0xff] }
 0x431   : > { %v810_v19 = vmul.f32 1.442695, %v809_v18  ;;  %v961_v18 = vld [vmem:[%s1590_s11 + $0x10] sm:$0xff] }
 0x433   : > { %1179 = vpow2.f32 %v810_v19  ;;  %v960_v19 = vld [vmem:[%s1590_s11 + $0x8] sm:$0xff] }
 0x436   : > { %v610_v20 = vpop.xlane.xlu0 %609 }
 0x437   : > { %1181 = vrcp.f32 %v610_v20 }
 0x439   : > { %v1180_v21 = vpop.eup %1179 }
 0x43a   : > { %1099 = vmatmul.msk.f32.vlgmr.msrb.gmra.mxu0 %vm511_vm5, %v1180_v21  ;;  %v812_v22 = vsel %vm511_vm5, %v1180_v21, 0.0 }
 0x43b   : > { %813 = vadd.xlane.f32.xlu2 %v812_v22  ;;  %v959_v22 = vld [vmem:[%s1590_s11] sm:$0xff] }
 0x43d   : > { %v1182_v23 = vpop.eup %1181 }
 0x43e   : > { %v723_v24 = vpop.xlane.xlu0 %722  ;;  %v638_v25 = vmul.f32 %v1182_v23, %v634_v9  ;;  %v969_v9 = vld [vmem:[%s1590_s11 + $0x50] sm:$0xff] }
 0x43f   : > { %1183 = vrcp.f32 %v723_v24  ;;  %984 = vmatpush.msrb.mxu3 %v969_v9 }
 0x440   : > { %1090 = vmatmul.msk.f32.vlgmr.msrb.gmra.mxu1 %vm511_vm5, %v638_v25 }
 0x441   : > { %930 = vmatpush.msrb.mxu1 %v910_v49 }
 0x445   : > { %v1184_v26 = vpop.eup %1183 }
 0x446   : > { %v751_v27 = vmul.f32 %v1184_v26, %v747_v10  ;;  %v968_v10 = vld [vmem:[%s1590_s11 + $0x48] sm:$0xff] }
 0x447   : > { %985 = vmatpush.msrb.mxu3 %v968_v10 }
 0x448   : > { %1096 = vmatmul.msk.f32.vlgmr.msra.gmra.mxu1 %vm511_vm5, %v751_v27 }
 0x449   : > { %986 = vmatpush.msrb.mxu3 %v967_v11 }
 0x44b   : > { %987 = vmatpush.msrb.mxu3 %v966_v12 }
 0x44d   : > { %988 = vmatpush.msrb.mxu3 %v965_v13 }
 0x44f   : > { %989 = vmatpush.msrb.mxu3 %v964_v14 }
 0x451   : > { %990 = vmatpush.msrb.mxu3 %v963_v15 }
 0x453   : > { %991 = vmatpush.msrb.mxu3 %v962_v16 }
 0x455   : > { %992 = vmatpush.msrb.mxu3 %v961_v18 }
 0x457   : > { %993 = vmatpush.msrb.mxu3 %v960_v19 }
 0x459   : > { %994 = vmatpush.msrb.mxu3 %v959_v22 }
 0x4ae   : > { %v814_v29 = vpop.xlane.xlu2 %813 }
 0x4af   : > { %1185 = vrcp.f32 %v814_v29 }
 0x4b5   : > { %v1186_v30 = vpop.eup %1185 }
 0x4b7   : > { %v838_v31 = vpop.f32.mrf.mxu0 }
 0x4b8   : > { %v842_v32 = vmul.f32 %v1186_v30, %v838_v31 }
 0x4ba   : > { %1101 = vmatmul.msk.f32.vlgmr.msra.gmra.mxu2 %vm511_vm5, %v842_v32 }
 0x4bd   : > { %v661_v33 = vpop.f32.mrf.mxu1 }
 0x4be   : > { %v685_v36 = vadd.f32 %v684_v34, %v661_v33 }
 0x4c5   : > { %v774_v35 = vpop.f32.mrf.mxu1 }
 0x4c6   : > { %v777_v37 = vadd.f32 %v774_v35, %v685_v36 }
 0x53d   : > { %v865_v39 = vpop.f32.mrf.mxu2 }
 0x53e   : > { %v868_v40 = vadd.f32 %v865_v39, %v777_v37 }
 0x540   : > { %v873_v41 = vadd.f32 %v1162_v38, %v868_v40  ;;  %v1166_v38 = vld [vmem:[%s1591_s12] ss:$0 sm:$0xff] }
 0x542   : > { %v1464_v42 = vadd.f32 %v873_v41, %v1392_v0  ;;  %v909_v0 = vld [vmem:[%s1588_s9 + $0x10] sm:$0xff] }
 0x543   : > { %931 = vmatpush.msrb.mxu1 %v909_v0 }
 0x544   : > { %v877_v43 = vsel %vm439_vm0, %v1464_v42, 0.0 }
 0x545   : > { %878 = vadd.xlane.f32.xlu0 %v877_v43  ;;  %932 = vmatpush.msrb.mxu1 %v908_v50 }
 0x547   : > { %933 = vmatpush.msrb.mxu1 %v907_v51 }
 0x5b8   : > { %v879_v44 = vpop.xlane.xlu0 %878 }
 0x5b9   : > { %v880_v45 = vmul.f32 %v879_v44, %v1396_v8 }
 0x5bb   : > { %v881_v46 = vsub.f32 %v1464_v42, %v880_v45 }
 0x5bd   : > { %v882_v47 = vmul.f32 %v881_v46, %v881_v46 }
 0x5bf   : > { %v883_v48 = vsel %vm439_vm0, %v882_v47, 0.0 }
 0x5c0   : > { %884 = vadd.xlane.f32.xlu0 %v883_v48 }
 0x633   : > { %v885_v52 = vpop.xlane.xlu0 %884 }
 0x634   : > { %v886_v53 = vmul.f32 %v885_v52, %v1396_v8  ;;  %v1164_v8 = vld [vmem:[%s1587_s8] ss:$0 sm:$0xff] }
 0x636   : > { %v887_v54 = vadd.f32 1e-05, %v886_v53 }
 0x638   : > { %1187 = vrsqrt.f32 %v887_v54  ;;  %vm894_vm7 = vweird.f32 %v887_v54 }
 0x63e   : > { %v1188_v55 = vpop.eup %1187 }
 0x63f   : > { %v889_v56 = vmul.f32 %v1188_v55, %v887_v54  ;;  %vm895_vm6 = vweird.f32 %v1188_v55 }
 0x640   : > { %vm896_vm8 = vmor %vm894_vm7, %vm895_vm6 }
 0x641   : > { %v890_v57 = vmul.f32 %v1188_v55, %v889_v56 }
 0x643   : > { %v891_v58 = vmul.f32 0.5, %v890_v57 }
 0x645   : > { %v892_v59 = vsub.f32 1.5, %v891_v58 }
 0x647   : > { %v893_v60 = vmul.f32 %v1188_v55, %v892_v59 }
 0x649   : > { %v897_v62 = vsel %vm896_vm8, %v1188_v55, %v893_v60 }
 0x64a   : > { %v898_v63 = vmul.f32 %v897_v62, %v881_v46 }
 0x64c   : > { %v902_v1 = vmul.f32 %v1163_v61, %v898_v63 }
 0x64e   : > { %v906_v2 = vadd.f32 %v1164_v8, %v902_v1 }
 0x650   : > { %1102 = vmatmul.msk.f32.vlgmr.msrb.gmra.mxu1 %vm439_vm0, %v906_v2 }
 0x6cd   : > { %v935_v20 = vpop.f32.mrf.mxu1 }
 0x6ce   : > { %v936_v21 = vadd.f32 %v1165_v17, %v935_v20 }
 0x6d0   : > { %v1103_v23 = vmul.f32 -1.702, %v936_v21 }
 0x6d2   : > { %v940_v24 = vmul.f32 1.442695, %v1103_v23 }
 0x6d4   : > { %1189 = vpow2.f32 %v940_v24 }
 0x6da   : > { %v1190_v25 = vpop.eup %1189 }
 0x6db   : > { %v942_v26 = vadd.f32 1.0, %v1190_v25 }
 0x6dd   : > { %1191 = vrcp.f32 %v942_v26  ;;  %v954_v30 = vand.u32 2147483648, %v942_v26  ;;  %v952_v32 = vand.u32 2147483647, %v942_v26  ;;  %vm948_vm10 = vweird.f32 %v942_v26 }
 0x6df   : > { %v955_v34 = vor.u32 1.1754944e-38, %v954_v30  ;;  %vm953_vm12 = vcmp.eq.f32.partialorder %v952_v32, 8.507059e+37 }
 0x6e3   : > { %v1192_v27 = vpop.eup %1191 }
 0x6e4   : > { %v944_v28 = vmul.f32 %v1192_v27, %v942_v26  ;;  %vm949_vm9 = vweird.f32 %v1192_v27 }
 0x6e5   : > { %vm950_vm11 = vmor %vm948_vm10, %vm949_vm9 }
 0x6e6   : > { %v945_v29 = vsub.f32 1.0, %v944_v28 }
 0x6e8   : > { %v946_v31 = vmul.f32 %v1192_v27, %v945_v29 }
 0x6ea   : > { %v947_v33 = vadd.f32 %v1192_v27, %v946_v31 }
 0x6ec   : > { %v951_v35 = vsel %vm950_vm11, %v1192_v27, %v947_v33 }
 0x6ed   : > { %v956_v36 = vsel %vm953_vm12, %v955_v34, %v951_v35 }
 0x6ee   : > { %v958_v37 = vmul.f32 %v956_v36, %v936_v21 }
 0x6f0   : > { %995 = vmatmul.f32.vlgmr.msrb.gmra.mxu3 %v958_v37 }
 0x773   : > { %v996_v39 = vpop.f32.mrf.mxu3 }
 0x774   : > { %v997_v40 = vadd.f32 %v1166_v38, %v996_v39 }
 0x776   : > { %v999_v41 = vadd.f32 %v997_v40, %v1464_v42 }
 0x778   : > { %1000 = vst.msk [vmem:[%s431_s15] sm:$0xff] %vm439_vm0, %v999_v41 }
 0x779   : > { %1220 = shalt.err (!%p1217_p3)
}
 0x77a   : > { %1108 = dma.vmem_to_hbm [thread:$0]  (%p1377_p5), %s1015_s16, 128, %s1017_s2, %s1002_s29  }
 0x77b PF: > { %p1114_p4 = scmp.ge.s32.totalorder %s1255_s28, 2  ;;  %s1028_s20 = sand.u32 1, %s1243_s25  }
 0x77c   : > { %s1029_s30 = scalar_lea.sflag [#allocation3], %s1028_s20 }
 0x77d   : > { %p1111_p7 = pnand %p1114_p4, %p1381_p6 }
 0x77f   : > { %p1112_p8 = pneg %p1111_p7 }
 0x781   : > { %1238 = dma.done.wait (%p1112_p8), %s1029_s30, 128  }
 0x782   : > { %1240 = vsyncadd (%p1112_p8), %s1029_s30, 4294967168  ;;  %p23_p9 = scmp.ge.s32.totalorder %s1364_s14, 4   ;;  %s1603_s25 = smov %s1247_s26 }
 0x783   : > { %s1604_s26 = smov %s1251_s27  ;;  %s1605_s27 = smov %s1375_s17 }
 0x784   : > { %s1606_s28 = smov %s1364_s14  ;;  %25 = sbr.rel (!%p23_p9) target bundleno = 8 (0x8), region = 110 }
 0x789   :  { %1035 = vsyncpa [#allocation3], 1 }
 0x78a   :  { %1037 = vsyncpa [#allocation3 + $0x1], 1 }

</bundles_post_ra>
